<compile_context>
chip_gen: v7x
topology: tpu7x:2x2x1
jax: 0.10.0
libtpu: 0.0.40
codegen_flags: <defaults>
</compile_context>

<pallas_src>
import jax
import jax.numpy as jnp
from jax.experimental import pallas as pl
from jax.experimental.pallas import tpu as pltpu

NUM_CLASSES = 80   # self.weights = torch.rand(80)
CP = 128           # class dim padded to the 128-lane width


# ----------------------------------------------------------------------------
# Kernel: K-tiled matmuls with f32 accumulators; epilogue (target-max, BCE
# sums, sigmoid(mean) meta-weights) runs only on the last K step.
# ----------------------------------------------------------------------------
def _metalearner_kernel(
    x_tr_ref,       # (B, tk)    bf16  train images, K tile
    x_va_ref,       # (B, tk)    bf16  val images,   K tile
    w_tr_ref,       # (tk, CP)   bf16  model_train weight, K tile (class-padded)
    w_va_ref,       # (tk, CP)   bf16  model_val weight,   K tile (class-padded)
    b_tr_ref,       # (1, CP)    f32   model_train bias (padded), resident
    b_va_ref,       # (1, CP)    f32   model_val bias (padded), resident
    tgt_tr_ref,     # (B, G, CP) f32   train targets (class zero-padded), resident
    tgt_va_ref,     # (B, G, CP) f32   val targets, resident
    cw_ref,         # (1, CP)    f32   self.weights (padded), resident
    losses_ref,     # (1, CP)    f32   lanes 0/1/2 = loss_tr / loss_val / loss_unw
    weight_ref,     # (1, CP)    f32   new self.weights (sigmoid of column means)
    acc_tr,         # (B, CP)    f32   scratch: x_tr @ W_train
    acc_va,         # (B, CP)    f32   scratch: x_va @ W_train
    acc_wv,         # (B, CP)    f32   scratch: x_va @ W_val
):
    k = pl.program_id(0)

    @pl.when(k == 0)
    def _():
        acc_tr[...] = jnp.zeros_like(acc_tr)
        acc_va[...] = jnp.zeros_like(acc_va)
        acc_wv[...] = jnp.zeros_like(acc_wv)

    # ---- inner loop: pure dot + accumulate (bf16 operands ~ autocast, f32 acc)
    x_tr = x_tr_ref[...]
    x_va = x_va_ref[...]
    w_tr = w_tr_ref[...]
    w_va = w_va_ref[...]
    acc_tr[...] += jnp.dot(x_tr, w_tr, preferred_element_type=jnp.float32)
    acc_va[...] += jnp.dot(x_va, w_tr, preferred_element_type=jnp.float32)
    acc_wv[...] += jnp.dot(x_va, w_va, preferred_element_type=jnp.float32)

    # ---- epilogue only on the final K step
    @pl.when(k == pl.num_programs(0) - 1)
    def _():
        logits_tr = acc_tr[...] + b_tr_ref[...]        # model_train(x_train)
        logits_va = acc_va[...] + b_tr_ref[...]        # model_train(x_val)
        weight_logits = acc_wv[...] + b_va_ref[...]    # model_val(x_val)

        lane = jax.lax.broadcasted_iota(jnp.int32, (1, CP), 1)
        lane_mask = (lane < NUM_CLASSES).astype(jnp.float32)

        def _bce(x, t):
            # numerically stable BCE-with-logits, per element
            return jnp.maximum(x, 0.0) - x * t + jnp.log1p(jnp.exp(-jnp.abs(x)))

        # train phase: criteria(model_train(x), target.max(1)[0], weights).sum()
        t_tr = jnp.max(tgt_tr_ref[...], axis=1)                     # target.max(dim=1)[0]
        pe_tr = _bce(logits_tr, t_tr) * lane_mask
        loss_tr = jnp.sum(pe_tr * cw_ref[...])

        # val phase: weight_ = sigmoid(model_val(x_val).mean(dim=0))
        w_new = jax.nn.sigmoid(
            jnp.mean(weight_logits, axis=0, keepdims=True)) * lane_mask
        weight_ref[...] = w_new

        # per-element val BCE computed ONCE, reused for weighted + unweighted sums
        t_va = jnp.max(tgt_va_ref[...], axis=1)
        pe_va = _bce(logits_va, t_va) * lane_mask
        loss_val = jnp.sum(pe_va * w_new)                           # weighted by new weight_
        loss_unw = jnp.sum(pe_va)                                   # weights = ones(80)

        losses_ref[...] = (
            (lane == 0).astype(jnp.float32) * loss_tr
            + (lane == 1).astype(jnp.float32) * loss_val
            + (lane == 2).astype(jnp.float32) * loss_unw
        )


# ----------------------------------------------------------------------------
# One-time parameter preparation (do NOT redo per step): pad class dim 80->128,
# pad feature dim to a tk multiple, store matmul weights persistently in bf16.
# ----------------------------------------------------------------------------
def _round_up(x, m):
    return (x + m - 1) // m * m


def prepare_metalearner_params(w_train, b_train, w_val, b_val, class_weights, *, tk):
    F = w_train.shape[0]
    F_pad = _round_up(F, tk)
    pad_f, pad_c = F_pad - F, CP - NUM_CLASSES
    w_tr = jnp.pad(w_train, ((0, pad_f), (0, pad_c))).astype(jnp.bfloat16)
    w_va = jnp.pad(w_val, ((0, pad_f), (0, pad_c))).astype(jnp.bfloat16)
    b_tr = jnp.pad(b_train.astype(jnp.float32), ((0, 0), (0, pad_c)))
    b_va = jnp.pad(b_val.astype(jnp.float32), ((0, 0), (0, pad_c)))
    cw = jnp.pad(class_weights.astype(jnp.float32), ((0, 0), (0, pad_c)))
    return w_tr, w_va, b_tr, b_va, cw


# ----------------------------------------------------------------------------
# Per-step wrapper: reshape/cast images (reshape copies anyway, so bf16 cast is
# free), launch the single K-tiled fused kernel.
# ----------------------------------------------------------------------------
def metalearner_forward_step(
    images_train, targets_train,      # (B,3,H,W), (B,G,80)
    images_val, targets_val,          # (B,3,H,W), (B,G,80)
    w_tr_pad, w_va_pad,               # (F_pad, CP) bf16  -- from prepare_*
    b_tr_pad, b_va_pad,               # (1, CP) f32
    cw_pad,                           # (1, CP) f32       == self.weights (padded)
    *, tk,
):
    B = images_train.shape[0]
    G = targets_train.shape[1]
    F = images_train.shape[1] * images_train.shape[2] * images_train.shape[3]
    F_pad = w_tr_pad.shape[0]
    assert F_pad % tk == 0, "tk must divide the padded feature dim"
    kt = F_pad // tk
    pad_c = CP - NUM_CLASSES
    pad_f = F_pad - F

    x_tr = jnp.pad(images_train.reshape(B, F).astype(jnp.bfloat16),
                   ((0, 0), (0, pad_f)))
    x_va = jnp.pad(images_val.reshape(B, F).astype(jnp.bfloat16),
                   ((0, 0), (0, pad_f)))
    tgt_tr = jnp.pad(targets_train.astype(jnp.float32),
                     ((0, 0), (0, 0), (0, pad_c)))
    tgt_va = jnp.pad(targets_val.astype(jnp.float32),
                     ((0, 0), (0, 0), (0, pad_c)))

    x_spec = pl.BlockSpec((B, tk), lambda k: (0, k))
    w_spec = pl.BlockSpec((tk, CP), lambda k: (k, 0))
    row_spec = pl.BlockSpec((1, CP), lambda k: (0, 0))
    tgt_spec = pl.BlockSpec((B, G, CP), lambda k: (0, 0, 0))

    losses, weight_pad = pl.pallas_call(
        _metalearner_kernel,
        out_shape=(
            jax.ShapeDtypeStruct((1, CP), jnp.float32),
            jax.ShapeDtypeStruct((1, CP), jnp.float32),
        ),
        grid_spec=pltpu.PrefetchScalarGridSpec(
            num_scalar_prefetch=0,
            grid=(kt,),
            in_specs=[x_spec, x_spec, w_spec, w_spec,
                      row_spec, row_spec, tgt_spec, tgt_spec, row_spec],
            out_specs=(row_spec, row_spec),
            scratch_shapes=[pltpu.VMEM((B, CP), jnp.float32)] * 3,
        ),
        compiler_params=pltpu.CompilerParams(
            dimension_semantics=("arbitrary",),
            vmem_limit_bytes=64 * 1024 * 1024,
        ),
    )(x_tr, x_va, w_tr_pad, w_va_pad, b_tr_pad, b_va_pad, tgt_tr, tgt_va, cw_pad)

    # self.weights = weight_  (returned so the caller carries it to next epoch)
    new_weights = weight_pad[:, :NUM_CLASSES]                                 # (1, 80)
    return losses[0, 0], losses[0, 1], losses[0, 2], new_weights


if __name__ == "__main__":
    key = jax.random.PRNGKey(0)
    ks = jax.random.split(key, 8)

    B, G, C_IN, H, W = 8, 3, 3, 16, 16
    F = C_IN * H * W          # 768
    # Small K tile so the toy run exercises the K grid (kt = 3).  At realistic
    # F (~150K) use tk ~ 4096 on v7x/v5e, up to 8192-16384 on v6e.
    TK = 256

    images_train = jax.random.normal(ks[0], (B, C_IN, H, W), jnp.float32)
    images_val = jax.random.normal(ks[1], (B, C_IN, H, W), jnp.float32)
    targets_train = (jax.random.uniform(ks[2], (B, G, NUM_CLASSES)) > 0.7).astype(jnp.float32)
    targets_val = (jax.random.uniform(ks[3], (B, G, NUM_CLASSES)) > 0.7).astype(jnp.float32)

    # deterministic synthetic stand-ins for model_train / model_val (linear heads)
    w_train = 0.02 * jax.random.normal(ks[4], (F, NUM_CLASSES), jnp.float32)
    b_train = jnp.zeros((1, NUM_CLASSES), jnp.float32)
    w_val = 0.02 * jax.random.normal(ks[5], (F, NUM_CLASSES), jnp.float32)
    b_val = jnp.zeros((1, NUM_CLASSES), jnp.float32)

    # self.weights = torch.rand(80)
    class_weights = jax.random.uniform(ks[6], (1, NUM_CLASSES), jnp.float32)

    # one-time prep: padded, bf16, persistent layout (not redone per step)
    w_tr_p, w_va_p, b_tr_p, b_va_p, cw_p = prepare_metalearner_params(
        w_train, b_train, w_val, b_val, class_weights, tk=TK)

    loss_train, loss_val, loss_unw, new_weights = metalearner_forward_step(
        images_train, targets_train, images_val, targets_val,
        w_tr_p, w_va_p, b_tr_p, b_va_p, cw_p, tk=TK)

    jax.block_until_ready((loss_train, loss_val, loss_unw, new_weights))
    print("KERNEL_OK")
</pallas_src>

<mosaic_0001>
module attributes {stable_mosaic.version = 11 : i64} {
  func.func @_metalearner_kernel(%arg0: i32, %arg1: memref<8x256xbf16, #tpu.memory_space<vmem>>, %arg2: memref<8x256xbf16, #tpu.memory_space<vmem>>, %arg3: memref<256x128xbf16, #tpu.memory_space<vmem>>, %arg4: memref<256x128xbf16, #tpu.memory_space<vmem>>, %arg5: memref<1x128xf32, #tpu.memory_space<vmem>>, %arg6: memref<1x128xf32, #tpu.memory_space<vmem>>, %arg7: memref<8x3x128xf32, #tpu.memory_space<vmem>>, %arg8: memref<8x3x128xf32, #tpu.memory_space<vmem>>, %arg9: memref<1x128xf32, #tpu.memory_space<vmem>>, %arg10: memref<1x128xf32, #tpu.memory_space<vmem>>, %arg11: memref<1x128xf32, #tpu.memory_space<vmem>>, %arg12: memref<8x128xf32, #tpu.memory_space<vmem>>, %arg13: memref<8x128xf32, #tpu.memory_space<vmem>>, %arg14: memref<8x128xf32, #tpu.memory_space<vmem>>) attributes {dimension_semantics = [#tpu.dimension_semantics<arbitrary>], iteration_bounds = array<i64: 3>, scalar_prefetch = 0 : i64, scratch_operands = 3 : i64, tpu.core_type = #tpu.core_type<tc>, window_params = [{transform_indices = @transform_0, window_bounds = array<i64: 8, 256>}, {transform_indices = @transform_1, window_bounds = array<i64: 8, 256>}, {transform_indices = @transform_2, window_bounds = array<i64: 256, 128>}, {transform_indices = @transform_3, window_bounds = array<i64: 256, 128>}, {pipeline_mode = #tpu.pipeline_mode<synchronous>, transform_indices = @transform_4, window_bounds = array<i64: 1, 128>}, {pipeline_mode = #tpu.pipeline_mode<synchronous>, transform_indices = @transform_5, window_bounds = array<i64: 1, 128>}, {pipeline_mode = #tpu.pipeline_mode<synchronous>, transform_indices = @transform_6, window_bounds = array<i64: 8, 3, 128>}, {pipeline_mode = #tpu.pipeline_mode<synchronous>, transform_indices = @transform_7, window_bounds = array<i64: 8, 3, 128>}, {pipeline_mode = #tpu.pipeline_mode<synchronous>, transform_indices = @transform_8, window_bounds = array<i64: 1, 128>}, {pipeline_mode = #tpu.pipeline_mode<synchronous>, transform_indices = @transform_9, window_bounds = array<i64: 1, 128>}, {pipeline_mode = #tpu.pipeline_mode<synchronous>, transform_indices = @transform_10, window_bounds = array<i64: 1, 128>}]} {
    %c0_i32 = arith.constant 0 : i32
    %0 = arith.cmpi eq, %arg0, %c0_i32 : i32
    %1 = arith.extui %0 : i1 to i32
    %c0_i32_0 = arith.constant 0 : i32
    %2 = arith.cmpi ne, %1, %c0_i32_0 : i32
    scf.if %2 {
      %cst_23 = arith.constant 0.000000e+00 : f32
      %22 = vector.broadcast %cst_23 : f32 to vector<8x128xf32>
      %c0_24 = arith.constant 0 : index
      %c0_25 = arith.constant 0 : index
      %23 = vector.load %arg12[%c0_24, %c0_25] : memref<8x128xf32, #tpu.memory_space<vmem>>, vector<8x128xf32>
      tpu.vector_store %arg12[%c0_24, %c0_25], %22 {strides = array<i32>} : memref<8x128xf32, #tpu.memory_space<vmem>>, vector<8x128xf32>,
      %cst_26 = arith.constant 0.000000e+00 : f32
      %24 = vector.broadcast %cst_26 : f32 to vector<8x128xf32>
      %c0_27 = arith.constant 0 : index
      %c0_28 = arith.constant 0 : index
      %25 = vector.load %arg13[%c0_27, %c0_28] : memref<8x128xf32, #tpu.memory_space<vmem>>, vector<8x128xf32>
      tpu.vector_store %arg13[%c0_27, %c0_28], %24 {strides = array<i32>} : memref<8x128xf32, #tpu.memory_space<vmem>>, vector<8x128xf32>,
      %cst_29 = arith.constant 0.000000e+00 : f32
      %26 = vector.broadcast %cst_29 : f32 to vector<8x128xf32>
      %c0_30 = arith.constant 0 : index
      %c0_31 = arith.constant 0 : index
      %27 = vector.load %arg14[%c0_30, %c0_31] : memref<8x128xf32, #tpu.memory_space<vmem>>, vector<8x128xf32>
      tpu.vector_store %arg14[%c0_30, %c0_31], %26 {strides = array<i32>} : memref<8x128xf32, #tpu.memory_space<vmem>>, vector<8x128xf32>,
    } else {
    }
    %c0 = arith.constant 0 : index
    %c0_1 = arith.constant 0 : index
    %3 = vector.load %arg1[%c0, %c0_1] : memref<8x256xbf16, #tpu.memory_space<vmem>>, vector<8x256xbf16>
    %c0_2 = arith.constant 0 : index
    %c0_3 = arith.constant 0 : index
    %4 = vector.load %arg2[%c0_2, %c0_3] : memref<8x256xbf16, #tpu.memory_space<vmem>>, vector<8x256xbf16>
    %c0_4 = arith.constant 0 : index
    %c0_5 = arith.constant 0 : index
    %5 = vector.load %arg3[%c0_4, %c0_5] : memref<256x128xbf16, #tpu.memory_space<vmem>>, vector<256x128xbf16>
    %c0_6 = arith.constant 0 : index
    %c0_7 = arith.constant 0 : index
    %6 = vector.load %arg4[%c0_6, %c0_7] : memref<256x128xbf16, #tpu.memory_space<vmem>>, vector<256x128xbf16>
    %c0_8 = arith.constant 0 : index
    %c0_9 = arith.constant 0 : index
    %7 = vector.load %arg12[%c0_8, %c0_9] : memref<8x128xf32, #tpu.memory_space<vmem>>, vector<8x128xf32>
    %cst = arith.constant dense<0.000000e+00> : vector<8x128xf32>
    %8 = tpu.matmul %3, %5, %cst {dimension_numbers = #tpu.dot_dimension_numbers<[1], [0], [0], [1], [0, 0, 1, 1], [], []>} : vector<8x256xbf16>, vector<256x128xbf16>, vector<8x128xf32> -> vector<8x128xf32>
    %9 = arith.addf %7, %8 : vector<8x128xf32>
    %c0_10 = arith.constant 0 : index
    %c0_11 = arith.constant 0 : index
    %10 = vector.load %arg12[%c0_10, %c0_11] : memref<8x128xf32, #tpu.memory_space<vmem>>, vector<8x128xf32>
    tpu.vector_store %arg12[%c0_10, %c0_11], %9 {strides = array<i32>} : memref<8x128xf32, #tpu.memory_space<vmem>>, vector<8x128xf32>,
    %c0_12 = arith.constant 0 : index
    %c0_13 = arith.constant 0 : index
    %11 = vector.load %arg13[%c0_12, %c0_13] : memref<8x128xf32, #tpu.memory_space<vmem>>, vector<8x128xf32>
    %cst_14 = arith.constant dense<0.000000e+00> : vector<8x128xf32>
    %12 = tpu.matmul %4, %5, %cst_14 {dimension_numbers = #tpu.dot_dimension_numbers<[1], [0], [0], [1], [0, 0, 1, 1], [], []>} : vector<8x256xbf16>, vector<256x128xbf16>, vector<8x128xf32> -> vector<8x128xf32>
    %13 = arith.addf %11, %12 : vector<8x128xf32>
    %c0_15 = arith.constant 0 : index
    %c0_16 = arith.constant 0 : index
    %14 = vector.load %arg13[%c0_15, %c0_16] : memref<8x128xf32, #tpu.memory_space<vmem>>, vector<8x128xf32>
    tpu.vector_store %arg13[%c0_15, %c0_16], %13 {strides = array<i32>} : memref<8x128xf32, #tpu.memory_space<vmem>>, vector<8x128xf32>,
    %c0_17 = arith.constant 0 : index
    %c0_18 = arith.constant 0 : index
    %15 = vector.load %arg14[%c0_17, %c0_18] : memref<8x128xf32, #tpu.memory_space<vmem>>, vector<8x128xf32>
    %cst_19 = arith.constant dense<0.000000e+00> : vector<8x128xf32>
    %16 = tpu.matmul %4, %6, %cst_19 {dimension_numbers = #tpu.dot_dimension_numbers<[1], [0], [0], [1], [0, 0, 1, 1], [], []>} : vector<8x256xbf16>, vector<256x128xbf16>, vector<8x128xf32> -> vector<8x128xf32>
    %17 = arith.addf %15, %16 : vector<8x128xf32>
    %c0_20 = arith.constant 0 : index
    %c0_21 = arith.constant 0 : index
    %18 = vector.load %arg14[%c0_20, %c0_21] : memref<8x128xf32, #tpu.memory_space<vmem>>, vector<8x128xf32>
    tpu.vector_store %arg14[%c0_20, %c0_21], %17 {strides = array<i32>} : memref<8x128xf32, #tpu.memory_space<vmem>>, vector<8x128xf32>,
    %c2_i32 = arith.constant 2 : i32
    %19 = arith.cmpi eq, %arg0, %c2_i32 : i32
    %20 = arith.extui %19 : i1 to i32
    %c0_i32_22 = arith.constant 0 : i32
    %21 = arith.cmpi ne, %20, %c0_i32_22 : i32
    scf.if %21 {
      %c0_23 = arith.constant 0 : index
      %c0_24 = arith.constant 0 : index
      %22 = vector.load %arg12[%c0_23, %c0_24] : memref<8x128xf32, #tpu.memory_space<vmem>>, vector<8x128xf32>
      %c0_25 = arith.constant 0 : index
      %c0_26 = arith.constant 0 : index
      %23 = vector.load %arg5[%c0_25, %c0_26] : memref<1x128xf32, #tpu.memory_space<vmem>>, vector<1x128xf32>
      %24 = vector.broadcast %23 : vector<1x128xf32> to vector<8x128xf32>
      %25 = arith.addf %22, %24 : vector<8x128xf32>
      %c0_27 = arith.constant 0 : index
      %c0_28 = arith.constant 0 : index
      %26 = vector.load %arg13[%c0_27, %c0_28] : memref<8x128xf32, #tpu.memory_space<vmem>>, vector<8x128xf32>
      %c0_29 = arith.constant 0 : index
      %c0_30 = arith.constant 0 : index
      %27 = vector.load %arg5[%c0_29, %c0_30] : memref<1x128xf32, #tpu.memory_space<vmem>>, vector<1x128xf32>
      %28 = vector.broadcast %27 : vector<1x128xf32> to vector<8x128xf32>
      %29 = arith.addf %26, %28 : vector<8x128xf32>
      %c0_31 = arith.constant 0 : index
      %c0_32 = arith.constant 0 : index
      %30 = vector.load %arg14[%c0_31, %c0_32] : memref<8x128xf32, #tpu.memory_space<vmem>>, vector<8x128xf32>
      %c0_33 = arith.constant 0 : index
      %c0_34 = arith.constant 0 : index
      %31 = vector.load %arg6[%c0_33, %c0_34] : memref<1x128xf32, #tpu.memory_space<vmem>>, vector<1x128xf32>
      %32 = vector.broadcast %31 : vector<1x128xf32> to vector<8x128xf32>
      %33 = arith.addf %30, %32 : vector<8x128xf32>
      %34 = tpu.iota {dimensions = array<i32: 1>} : vector<1x128xi32>
      %c80_i32 = arith.constant 80 : i32
      %35 = vector.broadcast %c80_i32 : i32 to vector<1x128xi32>
      %36 = arith.cmpi slt, %34, %35 : vector<1x128xi32>
      %37 = arith.extui %36 : vector<1x128xi1> to vector<1x128xi32>
      %38 = arith.sitofp %37 : vector<1x128xi32> to vector<1x128xf32>
      %c0_35 = arith.constant 0 : index
      %c0_36 = arith.constant 0 : index
      %c0_37 = arith.constant 0 : index
      %39 = vector.load %arg7[%c0_35, %c0_36, %c0_37] : memref<8x3x128xf32, #tpu.memory_space<vmem>>, vector<8x3x128xf32>
      %cst_38 = arith.constant dense<0xFF800000> : vector<8x128xf32>
      %40 = vector.multi_reduction <maximumf>, %39, %cst_38 [1] : vector<8x3x128xf32> to vector<8x128xf32>
      %cst_39 = arith.constant 0.000000e+00 : f32
      %41 = vector.broadcast %cst_39 : f32 to vector<8x128xf32>
      %42 = arith.maximumf %25, %41 : vector<8x128xf32>
      %43 = arith.mulf %25, %40 : vector<8x128xf32>
      %44 = arith.subf %42, %43 : vector<8x128xf32>
      %45 = math.absf %25 : vector<8x128xf32>
      %cst_40 = arith.constant 0.000000e+00 : f32
      %46 = vector.broadcast %cst_40 : f32 to vector<8x128xf32>
      %47 = arith.subf %46, %45 : vector<8x128xf32>
      %48 = math.exp %47 : vector<8x128xf32>
      %49 = math.log1p %48 : vector<8x128xf32>
      %50 = arith.addf %44, %49 : vector<8x128xf32>
      %51 = vector.broadcast %38 : vector<1x128xf32> to vector<8x128xf32>
      %52 = arith.mulf %50, %51 : vector<8x128xf32>
      %c0_41 = arith.constant 0 : index
      %c0_42 = arith.constant 0 : index
      %53 = vector.load %arg9[%c0_41, %c0_42] : memref<1x128xf32, #tpu.memory_space<vmem>>, vector<1x128xf32>
      %54 = vector.broadcast %53 : vector<1x128xf32> to vector<8x128xf32>
      %55 = arith.mulf %52, %54 : vector<8x128xf32>
      %56 = vector.shape_cast %55 : vector<8x128xf32> to vector<1x8x128xf32>
      %cst_43 = arith.constant dense<0.000000e+00> : vector<1xf32>
      %57 = vector.multi_reduction <add>, %56, %cst_43 [1, 2] : vector<1x8x128xf32> to vector<1xf32>
      %58 = vector.shape_cast %57 : vector<1xf32> to vector<1x1x1xf32>
      %59 = vector.extract %58[0, 0, 0] : f32 from vector<1x1x1xf32>
      %cst_44 = arith.constant dense<0.000000e+00> : vector<128xf32>
      %60 = vector.multi_reduction <add>, %33, %cst_44 [0] : vector<8x128xf32> to vector<128xf32>
      %61 = vector.shape_cast %60 : vector<128xf32> to vector<1x128xf32>
      %cst_45 = arith.constant 8.000000e+00 : f32
      %62 = vector.broadcast %cst_45 : f32 to vector<1x128xf32>
      %63 = arith.divf %61, %62 : vector<1x128xf32>
      %64 = arith.negf %63 : vector<1x128xf32>
      %65 = math.exp %64 : vector<1x128xf32>
      %cst_46 = arith.constant 1.000000e+00 : f32
      %66 = vector.broadcast %cst_46 : f32 to vector<1x128xf32>
      %67 = arith.addf %66, %65 : vector<1x128xf32>
      %68 = arith.divf %66, %67 : vector<1x128xf32>
      %69 = arith.mulf %68, %38 : vector<1x128xf32>
      %c0_47 = arith.constant 0 : index
      %c0_48 = arith.constant 0 : index
      %70 = vector.load %arg11[%c0_47, %c0_48] : memref<1x128xf32, #tpu.memory_space<vmem>>, vector<1x128xf32>
      tpu.vector_store %arg11[%c0_47, %c0_48], %69 {strides = array<i32>} : memref<1x128xf32, #tpu.memory_space<vmem>>, vector<1x128xf32>,
      %c0_49 = arith.constant 0 : index
      %c0_50 = arith.constant 0 : index
      %c0_51 = arith.constant 0 : index
      %71 = vector.load %arg8[%c0_49, %c0_50, %c0_51] : memref<8x3x128xf32, #tpu.memory_space<vmem>>, vector<8x3x128xf32>
      %cst_52 = arith.constant dense<0xFF800000> : vector<8x128xf32>
      %72 = vector.multi_reduction <maximumf>, %71, %cst_52 [1] : vector<8x3x128xf32> to vector<8x128xf32>
      %cst_53 = arith.constant 0.000000e+00 : f32
      %73 = vector.broadcast %cst_53 : f32 to vector<8x128xf32>
      %74 = arith.maximumf %29, %73 : vector<8x128xf32>
      %75 = arith.mulf %29, %72 : vector<8x128xf32>
      %76 = arith.subf %74, %75 : vector<8x128xf32>
      %77 = math.absf %29 : vector<8x128xf32>
      %cst_54 = arith.constant 0.000000e+00 : f32
      %78 = vector.broadcast %cst_54 : f32 to vector<8x128xf32>
      %79 = arith.subf %78, %77 : vector<8x128xf32>
      %80 = math.exp %79 : vector<8x128xf32>
      %81 = math.log1p %80 : vector<8x128xf32>
      %82 = arith.addf %76, %81 : vector<8x128xf32>
      %83 = vector.broadcast %38 : vector<1x128xf32> to vector<8x128xf32>
      %84 = arith.mulf %82, %83 : vector<8x128xf32>
      %85 = vector.broadcast %69 : vector<1x128xf32> to vector<8x128xf32>
      %86 = arith.mulf %84, %85 : vector<8x128xf32>
      %87 = vector.shape_cast %86 : vector<8x128xf32> to vector<1x8x128xf32>
      %cst_55 = arith.constant dense<0.000000e+00> : vector<1xf32>
      %88 = vector.multi_reduction <add>, %87, %cst_55 [1, 2] : vector<1x8x128xf32> to vector<1xf32>
      %89 = vector.shape_cast %88 : vector<1xf32> to vector<1x1x1xf32>
      %90 = vector.extract %89[0, 0, 0] : f32 from vector<1x1x1xf32>
      %91 = vector.shape_cast %84 : vector<8x128xf32> to vector<1x8x128xf32>
      %cst_56 = arith.constant dense<0.000000e+00> : vector<1xf32>
      %92 = vector.multi_reduction <add>, %91, %cst_56 [1, 2] : vector<1x8x128xf32> to vector<1xf32>
      %93 = vector.shape_cast %92 : vector<1xf32> to vector<1x1x1xf32>
      %94 = vector.extract %93[0, 0, 0] : f32 from vector<1x1x1xf32>
      %c0_i32_57 = arith.constant 0 : i32
      %95 = vector.broadcast %c0_i32_57 : i32 to vector<1x128xi32>
      %96 = arith.cmpi eq, %34, %95 : vector<1x128xi32>
      %97 = arith.extui %96 : vector<1x128xi1> to vector<1x128xi32>
      %98 = arith.sitofp %97 : vector<1x128xi32> to vector<1x128xf32>
      %99 = vector.broadcast %59 : f32 to vector<1x128xf32>
      %100 = arith.mulf %98, %99 : vector<1x128xf32>
      %c1_i32 = arith.constant 1 : i32
      %101 = vector.broadcast %c1_i32 : i32 to vector<1x128xi32>
      %102 = arith.cmpi eq, %34, %101 : vector<1x128xi32>
      %103 = arith.extui %102 : vector<1x128xi1> to vector<1x128xi32>
      %104 = arith.sitofp %103 : vector<1x128xi32> to vector<1x128xf32>
      %105 = vector.broadcast %90 : f32 to vector<1x128xf32>
      %106 = arith.mulf %104, %105 : vector<1x128xf32>
      %107 = arith.addf %100, %106 : vector<1x128xf32>
      %c2_i32_58 = arith.constant 2 : i32
      %108 = vector.broadcast %c2_i32_58 : i32 to vector<1x128xi32>
      %109 = arith.cmpi eq, %34, %108 : vector<1x128xi32>
      %110 = arith.extui %109 : vector<1x128xi1> to vector<1x128xi32>
      %111 = arith.sitofp %110 : vector<1x128xi32> to vector<1x128xf32>
      %112 = vector.broadcast %94 : f32 to vector<1x128xf32>
      %113 = arith.mulf %111, %112 : vector<1x128xf32>
      %114 = arith.addf %107, %113 : vector<1x128xf32>
      %c0_59 = arith.constant 0 : index
      %c0_60 = arith.constant 0 : index
      %115 = vector.load %arg10[%c0_59, %c0_60] : memref<1x128xf32, #tpu.memory_space<vmem>>, vector<1x128xf32>
      tpu.vector_store %arg10[%c0_59, %c0_60], %114 {strides = array<i32>} : memref<1x128xf32, #tpu.memory_space<vmem>>, vector<1x128xf32>,
    } else {
    }
    return
  }
  func.func @transform_0(%arg0: i32) -> (i32, i32) {
    %c0_i32 = arith.constant 0 : i32
    %c0_i32_0 = arith.constant 0 : i32
    return %c0_i32, %arg0 : i32, i32
  }
  func.func @transform_1(%arg0: i32) -> (i32, i32) {
    %c0_i32 = arith.constant 0 : i32
    %c0_i32_0 = arith.constant 0 : i32
    return %c0_i32, %arg0 : i32, i32
  }
  func.func @transform_2(%arg0: i32) -> (i32, i32) {
    %c0_i32 = arith.constant 0 : i32
    %c0_i32_0 = arith.constant 0 : i32
    return %arg0, %c0_i32 : i32, i32
  }
  func.func @transform_3(%arg0: i32) -> (i32, i32) {
    %c0_i32 = arith.constant 0 : i32
    %c0_i32_0 = arith.constant 0 : i32
    return %arg0, %c0_i32 : i32, i32
  }
  func.func @transform_4(%arg0: i32) -> (i32, i32) {
    %c0_i32 = arith.constant 0 : i32
    %c0_i32_0 = arith.constant 0 : i32
    %c0_i32_1 = arith.constant 0 : i32
    return %c0_i32, %c0_i32_0 : i32, i32
  }
  func.func @transform_5(%arg0: i32) -> (i32, i32) {
    %c0_i32 = arith.constant 0 : i32
    %c0_i32_0 = arith.constant 0 : i32
    %c0_i32_1 = arith.constant 0 : i32
    return %c0_i32, %c0_i32_0 : i32, i32
  }
  func.func @transform_6(%arg0: i32) -> (i32, i32, i32) {
    %c0_i32 = arith.constant 0 : i32
    %c0_i32_0 = arith.constant 0 : i32
    %c0_i32_1 = arith.constant 0 : i32
    %c0_i32_2 = arith.constant 0 : i32
    return %c0_i32, %c0_i32_0, %c0_i32_1 : i32, i32, i32
  }
  func.func @transform_7(%arg0: i32) -> (i32, i32, i32) {
    %c0_i32 = arith.constant 0 : i32
    %c0_i32_0 = arith.constant 0 : i32
    %c0_i32_1 = arith.constant 0 : i32
    %c0_i32_2 = arith.constant 0 : i32
    return %c0_i32, %c0_i32_0, %c0_i32_1 : i32, i32, i32
  }
  func.func @transform_8(%arg0: i32) -> (i32, i32) {
    %c0_i32 = arith.constant 0 : i32
    %c0_i32_0 = arith.constant 0 : i32
    %c0_i32_1 = arith.constant 0 : i32
    return %c0_i32, %c0_i32_0 : i32, i32
  }
  func.func @transform_9(%arg0: i32) -> (i32, i32) {
    %c0_i32 = arith.constant 0 : i32
    %c0_i32_0 = arith.constant 0 : i32
    %c0_i32_1 = arith.constant 0 : i32
    return %c0_i32, %c0_i32_0 : i32, i32
  }
  func.func @transform_10(%arg0: i32) -> (i32, i32) {
    %c0_i32 = arith.constant 0 : i32
    %c0_i32_0 = arith.constant 0 : i32
    %c0_i32_1 = arith.constant 0 : i32
    return %c0_i32, %c0_i32_0 : i32, i32
  }
}

</mosaic_0001>

<bundles_post_ra>
// kernel: tpu_custom_call.1
= control target key start
LH: loop header
LB: loop body
LE: loop exit
PB: predicated region body
PF: predicated region fallthrough
CT: control target
= control target key end

     0   :  { %s2753_s0 = inlined_call_operand.hbm [shape: bf16[8,768], index: 0, kind: input, shape index: {}]   ;;  %s2754_s1 = inlined_call_operand.hbm [shape: bf16[8,768], index: 1, kind: input, shape index: {}]   ;;  %s2755_s2 = inlined_call_operand.hbm [shape: bf16[768,128], index: 2, kind: input, shape index: {}]   ;;  %s2756_s3 = inlined_call_operand.hbm [shape: bf16[768,128], index: 3, kind: input, shape index: {}]   ;;  %s2757_s4 = inlined_call_operand.hbm [shape: f32[1,128], index: 4, kind: input, shape index: {}]   ;;  %s2758_s5 = inlined_call_operand.hbm [shape: f32[1,128], index: 5, kind: input, shape index: {}]   ;;  %s2759_s6 = inlined_call_operand.hbm [shape: f32[8,3,128], index: 6, kind: input, shape index: {}]   ;;  %s2760_s7 = inlined_call_operand.hbm [shape: f32[8,3,128], index: 7, kind: input, shape index: {}]   ;;  %s2761_s8 = inlined_call_operand.hbm [shape: f32[1,128], index: 8, kind: input, shape index: {}]   ;;  %s2762_s9 = inlined_call_operand.hbm [shape: f32[1,128], index: 9, kind: output, shape index: {0}]   ;;  %s2763_s10 = inlined_call_operand.hbm [shape: f32[1,128], index: 10, kind: output, shape index: {1}]  }
   0x1   :  { %2790 = sst [smem:[#allocation35_spill]] %s2754_s1 }
   0x2   :  { %2791 = sst [smem:[#allocation36_spill]] %s2757_s4 }
   0x3   :  { %2792 = sst [smem:[#allocation37_spill]] %s2758_s5 }
   0x4   :  { %2793 = sst [smem:[#allocation38_spill]] %s2760_s7 }
   0x5   :  { %2794 = sst [smem:[#allocation39_spill]] %s2762_s9 }
   0x6   :  { %2795 = sst [smem:[#allocation40_spill]] %s2763_s10 }
   0x7   :  { %16 = vsyncpa [#allocation6], 0 }
   0x8   :  { %18 = vsyncpa [#allocation6 + $0x1], 0 }
   0x9   :  { %19 = vsyncpa [#allocation9], 0 }
   0xa   :  { %21 = vsyncpa [#allocation9 + $0x1], 0 }
   0xb   :  { %22 = vsyncpa [#allocation12], 0 }
   0xc   :  { %24 = vsyncpa [#allocation12 + $0x1], 0 }
   0xd   :  { %25 = vsyncpa [#allocation15], 0 }
   0xe   :  { %26 = vsyncpa [#allocation18], 0 }
   0xf   :  { %27 = vsyncpa [#allocation7], 0 }
  0x10   :  { %28 = vsyncpa [#allocation22], 0  ;;  %s2227_s13 = smov 0   ;;  %s2229_s14 = smov 0  }
  0x11   :  { %s2231_s15 = smov 0   ;;  %s2233_s16 = smov 0  }
  0x12 LB: > { %2796 = sst [smem:[#allocation31_spill]] %s2151_s15  ;;  %s2157_s17 = smov [#allocation13]   ;;  %s2155_s16 = sphi %s2233_s16, %s2836_s16   ;;  %s2151_s15 = sphi %s2231_s15, %s2838_s15   ;;  %s2147_s14 = sphi %s2229_s14, %s2840_s14   ;;  %s2143_s13 = sphi %s2227_s13, %s2839_s13  }
  0x13   : > { %s303_s18 = sshll.u32 %s2157_s17, 4  ;;  %s2248_s19 = sadd.s32 4294967295, %s2155_s16   ;;  %s304_s18 = int_to_ptr.vmem [resolvable:$true] %s303_s18 }
  0x14   : > { %2797 = sst [smem:[#allocation32_spill]] %s2248_s19  ;;  %p1453_p0 = scmp.ge.s32.totalorder %s2155_s16, 1 }
  0x15   : > { %p2764_p1 = scmp.eq.s32.totalorder %s2248_s19, 0  ;;  %p290_p2 = scmp.lt.s32.totalorder %s2155_s16, 4 }
  0x16   : > { %s2158_s21 = smov [#allocation14]   ;;  %s2159_s24 = smov [#allocation17]  }
  0x17   : > { %p2254_p4 = pnand %p1453_p0, %p290_p2  ;;  %s314_s22 = sshll.u32 %s2158_s21, 4  ;;  %s2260_s22 = int_to_ptr.vmem [resolvable:$true] %s314_s22 }
  0x18   : > { %s337_s25 = sshll.u32 %s2159_s24, 4  ;;  %s2800_s4 = sld [smem:[#allocation36_spill]]  ;;  %s2268_s25 = int_to_ptr.vmem [resolvable:$true] %s337_s25 }
  0x19   : > { %s2798_s20 = scalar_select %p2254_p4, 1, 0 }
  0x1a   : > { %p1646_p5 = pneg %p2254_p4 }
  0x1c   : > { %p2264_p6 = pnand %p1646_p5, %p2764_p1 }
  0x1e   : > { %s2799_s23 = scalar_select %p2264_p6, 1, 0 }
  0x1f   : > { %s1781_s28 = scalar_lea.hbm %s2800_s4, 16  ;;  %p2278_p8 = pneg %p2264_p6 }
  0x20   : > { %p1782_p7 = scmp.ne.s32.totalorder %s2800_s4, %s1781_s28  ;;  %p1788_p11 = scmp.lt.u32.totalorder %s1781_s28, %s2800_s4 }
  0x21   : > { %s2801_s11 = scalar_select %p2278_p8, 1, 0 }
  0x22   : > { %p1784_p9 = pnand %p2278_p8, %p1782_p7 }
  0x24   : > { %p1785_p10 = pneg %p1784_p9 }
  0x26   : > { %p1790_p12 = pnand %p1788_p11, %p1785_p10 }
  0x28   : > { %1793 = shalt.err (!%p1790_p12)
}
  0x29   : > { %s1794_s21 = scalar_lea.vmem %s304_s18, 16  ;;  %s1801_s24 = scalar_lea.vmem %s304_s18, 32 }
  0x2a   : > { %p1795_p13 = scmp.ne.s32.totalorder %s304_s18, %s1794_s21  ;;  %p1802_p5 = scmp.lt.s32.totalorder %s304_s18, %s304_s18 }
  0x2b   : > { %p1803_p3 = scmp.lt.s32.totalorder %s1801_s24, %s1794_s21 }
  0x2c   : > { %p1797_p0 = pnand %p1795_p13, %p2278_p8 }
  0x2d   : > { %p1804_p1 = por %p1803_p3, %p1802_p5 }
  0x2e   : > { %p1798_p2 = pneg %p1797_p0 }
  0x30   : > { %p1805_p4 = pnand %p1804_p1, %p1798_p2 }
  0x32   : > { %1808 = shalt.err (!%p1805_p4)
}
  0x33   : > { %1649 = dma.hbm_to_vmem [thread:$0]  (!%p2264_p6), %s2800_s4, 16, %s304_s18, [#allocation12]  }
  0x34   : > { %s2802_s5 = sld [smem:[#allocation37_spill]] }
  0x3a   : > { %s1809_s30 = scalar_lea.hbm %s2802_s5, 16 }
  0x3b   : > { %p1810_p7 = scmp.ne.s32.totalorder %s2802_s5, %s1809_s30  ;;  %p1816_p1 = scmp.lt.u32.totalorder %s1809_s30, %s2802_s5 }
  0x3d   : > { %p1812_p9 = pnand %p1810_p7, %p2278_p8 }
  0x3f   : > { %p1813_p3 = pneg %p1812_p9 }
  0x41   : > { %p1818_p4 = pnand %p1816_p1, %p1813_p3 }
  0x43   : > { %1821 = shalt.err (!%p1818_p4)
}
  0x44   : > { %s1822_s18 = scalar_lea.vmem %s2260_s22, 16  ;;  %s1829_s26 = scalar_lea.vmem %s2260_s22, 32 }
  0x45   : > { %p1823_p10 = scmp.ne.s32.totalorder %s2260_s22, %s1822_s18  ;;  %p1830_p13 = scmp.lt.s32.totalorder %s2260_s22, %s2260_s22 }
  0x46   : > { %p1831_p0 = scmp.lt.s32.totalorder %s1829_s26, %s1822_s18 }
  0x47   : > { %p1825_p11 = pnand %p1823_p10, %p2278_p8 }
  0x48   : > { %p1832_p2 = por %p1831_p0, %p1830_p13 }
  0x49   : > { %p1826_p12 = pneg %p1825_p11 }
  0x4b   : > { %p1833_p5 = pnand %p1832_p2, %p1826_p12 }
  0x4d   : > { %1836 = shalt.err (!%p1833_p5)
}
  0x4e   : > { %1652 = dma.hbm_to_vmem [thread:$0]  (!%p2264_p6), %s2802_s5, 16, %s2260_s22, [#allocation15]  }
  0x4f   : > { %s2803_s7 = sld [smem:[#allocation38_spill]] }
  0x55   : > { %s1837_s12 = scalar_lea.hbm %s2803_s7, 512 }
  0x56   : > { %p1838_p7 = scmp.ne.s32.totalorder %s2803_s7, %s1837_s12  ;;  %p1844_p1 = scmp.lt.u32.totalorder %s1837_s12, %s2803_s7 }
  0x58   : > { %p1840_p9 = pnand %p1838_p7, %p2278_p8 }
  0x5a   : > { %p1841_p3 = pneg %p1840_p9 }
  0x5c   : > { %p1846_p4 = pnand %p1844_p1, %p1841_p3 }
  0x5e   : > { %1849 = shalt.err (!%p1846_p4)
}
  0x5f   : > { %s1850_s22 = scalar_lea.vmem %s2268_s25, 512  ;;  %p1858_p13 = scmp.lt.s32.totalorder %s2268_s25, %s2268_s25 }
  0x60   : > { %p1851_p10 = scmp.ne.s32.totalorder %s2268_s25, %s1850_s22  ;;  %p1859_p0 = scmp.lt.s32.totalorder %s1850_s22, %s1850_s22 }
  0x62   : > { %p1853_p11 = pnand %p1851_p10, %p2278_p8  ;;  %p1860_p2 = por %p1859_p0, %p1858_p13 }
  0x64   : > { %p1854_p12 = pneg %p1853_p11 }
  0x66   : > { %p1861_p5 = pnand %p1860_p2, %p1854_p12 }
  0x68   : > { %1864 = shalt.err (!%p1861_p5)
}
  0x69   : > { %s2766_s26 = smov 64   ;;  %s2768_s27 = smov 4  }
  0x6a   : > { %1658 = dma.hbm_to_vmem [thread:$0]  (!%p2264_p6), %s2803_s7, 512, %s2268_s25, [#allocation18], %s2766_s26, %s2766_s26, %s2768_s27  }
  0x6b   : > { %s2345_s30 = sadd.s32 1, %s2155_s16   ;;  %s41_s17 = sadd.s32 1, %s2151_s15 }
  0x6c   : > { %2804 = sst [smem:[#allocation33_spill]] %s2345_s30  ;;  %s38_s12 = ssub.s32 %s2155_s16, %s2345_s30 }
  0x6d   : > { %p39_p7 = scmp.eq.s32.totalorder %s38_s12, 0  ;;  %p48_p9 = scmp.ne.s32.totalorder %s2151_s15, %s2147_s14 }
  0x6e   : > { %p49_p3 = scmp.eq.s32.totalorder %s2155_s16, 0  ;;  %p54_p1 = scmp.ne.s32.totalorder %s2147_s14, %s2143_s13 }
  0x6f   : > { %s2356_s21 = scalar_select %p39_p7, %s2151_s15, %s41_s17  }
  0x70   : > { %p50_p4 = por %p49_p3, %p48_p9  ;;  %p2806_p10 = scmp.eq.s32.totalorder %s2248_s19, 0 }
  0x71   : > { %2805 = sst [smem:[#allocation34_spill]] %s2356_s21  ;;  %p1680_p12 = scmp.lt.s32.totalorder %s2155_s16, 3 }
  0x72   : > { %p2360_p11 = por %p2806_p10, %p54_p1  ;;  %s2366_s25 = sand.u32 1, %s2151_s15  }
  0x73   : > { %s2770_s18 = sshll.u32 %s2366_s25, 3  ;;  %s2771_s22 = sshll.u32 %s2155_s16, 7 }
  0x74   : > { %s2807_s24 = scalar_select %p2360_p11, 1, 0 }
  0x75   : > { %p2370_p13 = pnand %p1680_p12, %p50_p4  ;;  %s2772_s13 = sand.u32 1, %s2155_s16  }
  0x76   : > { %s2809_s1 = sld [smem:[#allocation35_spill]]  ;;  %s385_s26 = scalar_lea.vmem [#allocation8], %s2770_s18 }
  0x77   : > { %s2808_s28 = scalar_select %p2370_p13, 1, 0 }
  0x78   : > { %s393_s27 = sshll.u32 %s385_s26, 4  ;;  %s2389_s5 = scalar_lea.sflag [#allocation9], %s2772_s13  ;;  %s2385_s27 = int_to_ptr.vmem [resolvable:$true] %s393_s27 }
  0x79   : > { %p2395_p2 = pneg %p2370_p13 }
  0x7b   : > { %s2810_s29 = scalar_select %p2395_p2, 1, 0 }
  0x7c   : > { %s2380_s17 = scalar_lea.hbm %s2809_s1, %s2771_s22  ;;  %s1870_s26 = scalar_lea.hbm %s2809_s1, 384 }
  0x7d   : > { %s1865_s7 = scalar_lea.hbm %s2380_s17, 128  ;;  %p1871_p9 = scmp.lt.u32.totalorder %s2380_s17, %s2809_s1 }
  0x7e   : > { %p1866_p0 = scmp.ne.s32.totalorder %s2380_s17, %s1865_s7  ;;  %p1872_p3 = scmp.lt.u32.totalorder %s1870_s26, %s1865_s7 }
  0x7f   : > { %p1874_p4 = scmp.lt.u32.totalorder %s1865_s7, %s2380_s17 }
  0x80   : > { %p1868_p5 = pnand %p2395_p2, %p1866_p0  ;;  %p1873_p1 = por %p1872_p3, %p1871_p9 }
  0x82   : > { %p1869_p7 = pneg %p1868_p5  ;;  %p1875_p10 = por %p1874_p4, %p1873_p1 }
  0x84   : > { %p1876_p12 = pnand %p1875_p10, %p1869_p7 }
  0x86   : > { %1879 = shalt.err (!%p1876_p12)
}
  0x87   : > { %s1880_s13 = scalar_lea.vmem %s2385_s27, 128  ;;  %s2162_s18 = smov [#allocation8]  }
  0x88   : > { %p1881_p0 = scmp.ne.s32.totalorder %s2385_s27, %s1880_s13  ;;  %s1885_s12 = sshll.u32 %s2162_s18, 4  ;;  %s1886_s12 = int_to_ptr.vmem [resolvable:$false] %s1885_s12 }
  0x89   : > { %s1887_s4 = scalar_lea.vmem %s1886_s12, 256  ;;  %p1888_p6 = scmp.lt.s32.totalorder %s2385_s27, %s1886_s12 }
  0x8a   : > { %p1883_p5 = pnand %p1881_p0, %p2395_p2  ;;  %p1889_p8 = scmp.lt.s32.totalorder %s1887_s4, %s1880_s13 }
  0x8c   : > { %p1884_p11 = pneg %p1883_p5  ;;  %p1890_p9 = por %p1889_p8, %p1888_p6 }
  0x8e   : > { %p1891_p3 = pnand %p1890_p9, %p1884_p11 }
  0x90   : > { %1894 = shalt.err (!%p1891_p3)
}
  0x91   : > { %1668 = dma.hbm_to_vmem [thread:$0]  (!%p2370_p13), %s2380_s17, 128, %s2385_s27, %s2389_s5  }
  0x92   : > { %s2811_s7 = sshll.u32 %s2366_s25, 7  ;;  %s2163_s4 = smov [#allocation16]  }
  0x93   : > { %s404_s22 = scalar_lea.vmem [#allocation10], %s2811_s7  ;;  %s2812_s18 = smov %s2811_s7 }
  0x94   : > { %s411_s26 = sshll.u32 %s404_s22, 4  ;;  %s425_s12 = scalar_lea.vmem [#allocation11], %s2812_s18  ;;  %s2421_s26 = int_to_ptr.vmem [resolvable:$true] %s411_s26 }
  0x95   : > { %s432_s13 = sshll.u32 %s425_s12, 4  ;;  %s324_s1 = sshll.u32 %s2163_s4, 4  ;;  %s2425_s13 = int_to_ptr.vmem [resolvable:$true] %s432_s13  ;;  %s325_s1 = int_to_ptr.vmem [resolvable:$true] %s324_s1 }
  0x96   : > { %s1895_s30 = scalar_lea.hbm %s2759_s6, 512  ;;  %p2813_p8 = scmp.ne.s32.totalorder %s2801_s11, 0 }
  0x97   : > { %p1896_p6 = scmp.ne.s32.totalorder %s2759_s6, %s1895_s30  ;;  %p1902_p1 = scmp.lt.u32.totalorder %s1895_s30, %s2759_s6 }
  0x99   : > { %p1898_p11 = pnand %p1896_p6, %p2813_p8 }
  0x9b   : > { %p1899_p7 = pneg %p1898_p11 }
  0x9d   : > { %p1904_p4 = pnand %p1902_p1, %p1899_p7 }
  0x9f   : > { %1907 = shalt.err (!%p1904_p4)
}
  0xa0   : > { %s1908_s7 = scalar_lea.vmem %s325_s1, 512  ;;  %p1916_p5 = scmp.lt.s32.totalorder %s325_s1, %s325_s1 }
  0xa1   : > { %p1909_p10 = scmp.ne.s32.totalorder %s325_s1, %s1908_s7  ;;  %p1917_p9 = scmp.lt.s32.totalorder %s1908_s7, %s1908_s7 }
  0xa3   : > { %p1911_p12 = pnand %p1909_p10, %p2813_p8  ;;  %p1918_p3 = por %p1917_p9, %p1916_p5 }
  0xa5   : > { %p1912_p0 = pneg %p1911_p12 }
  0xa7   : > { %p1919_p13 = pnand %p1918_p3, %p1912_p0 }
  0xa9   : > { %1922 = shalt.err (!%p1919_p13)
}
  0xaa   : > { %p2814_p6 = scmp.ne.s32.totalorder %s2799_s23, 0  ;;  %s2815_s9 = smov 4  }
  0xab   : > { %s2816_s10 = smov 64   ;;  %s2164_s21 = smov [#allocation19]  }
  0xac   : > { %1655 = dma.hbm_to_vmem [thread:$0]  (!%p2814_p6), %s2759_s6, 512, %s325_s1, [#allocation15], %s2816_s10, %s2816_s10, %s2815_s9  }
  0xad   : > { %s351_s22 = sshll.u32 %s2164_s21, 4  ;;  %s1923_s4 = scalar_lea.hbm %s2761_s8, 16  ;;  %s352_s22 = int_to_ptr.vmem [resolvable:$true] %s351_s22 }
  0xae   : > { %p1924_p13 = scmp.ne.s32.totalorder %s2761_s8, %s1923_s4  ;;  %p1930_p1 = scmp.lt.u32.totalorder %s1923_s4, %s2761_s8 }
  0xb0   : > { %p1926_p11 = pnand %p1924_p13, %p2813_p8 }
  0xb2   : > { %p1927_p7 = pneg %p1926_p11 }
  0xb4   : > { %p1932_p4 = pnand %p1930_p1, %p1927_p7 }
  0xb6   : > { %1935 = shalt.err (!%p1932_p4)
}
  0xb7   : > { %s1936_s1 = scalar_lea.vmem %s352_s22, 16  ;;  %s1943_s15 = scalar_lea.vmem %s352_s22, 32 }
  0xb8   : > { %p1937_p10 = scmp.ne.s32.totalorder %s352_s22, %s1936_s1  ;;  %p1944_p5 = scmp.lt.s32.totalorder %s352_s22, %s352_s22 }
  0xb9   : > { %p1945_p9 = scmp.lt.s32.totalorder %s1943_s15, %s1936_s1 }
  0xba   : > { %p1939_p12 = pnand %p1937_p10, %p2813_p8 }
  0xbb   : > { %p1946_p3 = por %p1945_p9, %p1944_p5 }
  0xbc   : > { %p1940_p0 = pneg %p1939_p12 }
  0xbe   : > { %p1947_p2 = pnand %p1946_p3, %p1940_p0 }
  0xc0   : > { %1950 = shalt.err (!%p1947_p2)
}
  0xc1   : > { %1661 = dma.hbm_to_vmem [thread:$0]  (!%p2814_p6), %s2761_s8, 16, %s352_s22, [#allocation18]  }
  0xc2   : > { %s2817_s19 = sshll.u32 %s2155_s16, 7  ;;  %s2818_s4 = sshll.u32 %s2366_s25, 3 }
  0xc3   : > { %s2471_s12 = scalar_lea.hbm %s2753_s0, %s2817_s19  ;;  %s366_s23 = scalar_lea.vmem [#allocation5], %s2818_s4 }
  0xc4   : > { %s374_s27 = sshll.u32 %s366_s23, 4  ;;  %s1536_s17 = sshll.u32 %s2155_s16, 11  ;;  %s2475_s27 = int_to_ptr.vmem [resolvable:$true] %s374_s27 }
  0xc5   : > { %s363_s7 = scalar_lea.sflag [#allocation6], %s2366_s25  ;;  %s1951_s1 = scalar_lea.hbm %s2471_s12, 128 }
  0xc6   : > { %p1952_p2 = scmp.ne.s32.totalorder %s2471_s12, %s1951_s1  ;;  %p2819_p8 = scmp.ne.s32.totalorder %s2810_s29, 0 }
  0xc7   : > { %s1956_s30 = scalar_lea.hbm %s2753_s0, 384  ;;  %p1957_p11 = scmp.lt.u32.totalorder %s2471_s12, %s2753_s0 }
  0xc8   : > { %p1954_p6 = pnand %p1952_p2, %p2819_p8  ;;  %p1958_p7 = scmp.lt.u32.totalorder %s1956_s30, %s1951_s1 }
  0xc9   : > { %p1960_p4 = scmp.lt.u32.totalorder %s1951_s1, %s2471_s12 }
  0xca   : > { %p1955_p13 = pneg %p1954_p6  ;;  %p1959_p1 = por %p1958_p7, %p1957_p11 }
  0xcc   : > { %p1961_p10 = por %p1960_p4, %p1959_p1 }
  0xce   : > { %p1962_p12 = pnand %p1961_p10, %p1955_p13 }
  0xd0   : > { %1965 = shalt.err (!%p1962_p12)
}
  0xd1   : > { %s1966_s25 = scalar_lea.vmem %s2475_s27, 128  ;;  %s2165_s11 = smov [#allocation5]  }
  0xd2   : > { %p1967_p0 = scmp.ne.s32.totalorder %s2475_s27, %s1966_s25  ;;  %s1971_s18 = sshll.u32 %s2165_s11, 4  ;;  %s1972_s18 = int_to_ptr.vmem [resolvable:$false] %s1971_s18 }
  0xd3   : > { %s1973_s4 = scalar_lea.vmem %s1972_s18, 256  ;;  %p1974_p3 = scmp.lt.s32.totalorder %s2475_s27, %s1972_s18 }
  0xd4   : > { %p1969_p5 = pnand %p1967_p0, %p2819_p8  ;;  %p1975_p2 = scmp.lt.s32.totalorder %s1973_s4, %s1966_s25 }
  0xd6   : > { %p1970_p9 = pneg %p1969_p5  ;;  %p1976_p6 = por %p1975_p2, %p1974_p3 }
  0xd8   : > { %p1977_p11 = pnand %p1976_p6, %p1970_p9 }
  0xda   : > { %1980 = shalt.err (!%p1977_p11)
}
  0xdb   : > { %p2820_p13 = scmp.ne.s32.totalorder %s2808_s28, 0  ;;  %s2505_s22 = scalar_lea.hbm %s2755_s2, %s1536_s17 }
  0xdc   : > { %s2512_s21 = scalar_lea.hbm %s2756_s3, %s1536_s17  ;;  %s1981_s19 = scalar_lea.hbm %s2505_s22, 2048 }
  0xdd   : > { %1665 = dma.hbm_to_vmem [thread:$0]  (!%p2820_p13), %s2471_s12, 128, %s2475_s27, %s363_s7  }
  0xde   : > { %p1982_p7 = scmp.ne.s32.totalorder %s2505_s22, %s1981_s19  ;;  %s1986_s7 = scalar_lea.hbm %s2755_s2, 6144 }
  0xdf   : > { %p1987_p10 = scmp.lt.u32.totalorder %s2505_s22, %s2755_s2  ;;  %p1988_p12 = scmp.lt.u32.totalorder %s1986_s7, %s1981_s19 }
  0xe0   : > { %p1984_p1 = pnand %p1982_p7, %p2819_p8  ;;  %p1990_p5 = scmp.lt.u32.totalorder %s1981_s19, %s2505_s22 }
  0xe1   : > { %p1989_p0 = por %p1988_p12, %p1987_p10 }
  0xe2   : > { %p1985_p4 = pneg %p1984_p1 }
  0xe3   : > { %p1991_p9 = por %p1990_p5, %p1989_p0 }
  0xe5   : > { %p1992_p3 = pnand %p1991_p9, %p1985_p4 }
  0xe7   : > { %1995 = shalt.err (!%p1992_p3)
}
  0xe8   : > { %s1996_s17 = scalar_lea.vmem %s2421_s26, 2048  ;;  %s2166_s18 = smov [#allocation10]  }
  0xe9   : > { %p1997_p2 = scmp.ne.s32.totalorder %s2421_s26, %s1996_s17  ;;  %s2001_s4 = sshll.u32 %s2166_s18, 4  ;;  %s2002_s4 = int_to_ptr.vmem [resolvable:$false] %s2001_s4 }
  0xea   : > { %s2003_s23 = scalar_lea.vmem %s2002_s4, 4096  ;;  %p2004_p7 = scmp.lt.s32.totalorder %s2421_s26, %s2002_s4 }
  0xeb   : > { %p1999_p6 = pnand %p1997_p2, %p2819_p8  ;;  %p2005_p1 = scmp.lt.s32.totalorder %s2003_s23, %s1996_s17 }
  0xed   : > { %p2000_p11 = pneg %p1999_p6  ;;  %p2006_p10 = por %p2005_p1, %p2004_p7 }
  0xef   : > { %p2007_p12 = pnand %p2006_p10, %p2000_p11 }
  0xf1   : > { %2010 = shalt.err (!%p2007_p12)
}
  0xf2   : > { %1671 = dma.hbm_to_vmem [thread:$0]  (!%p2820_p13), %s2505_s22, 2048, %s2421_s26, %s2389_s5, %s2816_s10, %s2816_s10, %s2815_s9  }
  0xf3   : > { %s2821_s1 = sand.u32 1, %s2155_s16   ;;  %s2011_s30 = scalar_lea.hbm %s2512_s21, 2048 }
  0xf4   : > { %s2541_s15 = scalar_lea.sflag [#allocation12], %s2821_s1  ;;  %p2012_p4 = scmp.ne.s32.totalorder %s2512_s21, %s2011_s30 }
  0xf5   : > { %s2016_s27 = scalar_lea.hbm %s2756_s3, 6144  ;;  %p2017_p9 = scmp.lt.u32.totalorder %s2512_s21, %s2756_s3 }
  0xf6   : > { %p2014_p0 = pnand %p2012_p4, %p2819_p8  ;;  %p2018_p3 = scmp.lt.u32.totalorder %s2016_s27, %s2011_s30 }
  0xf7   : > { %p2020_p6 = scmp.lt.u32.totalorder %s2011_s30, %s2512_s21 }
  0xf8   : > { %p2015_p5 = pneg %p2014_p0  ;;  %p2019_p2 = por %p2018_p3, %p2017_p9 }
  0xfa   : > { %p2021_p11 = por %p2020_p6, %p2019_p2 }
  0xfc   : > { %p2022_p7 = pnand %p2021_p11, %p2015_p5 }
  0xfe   : > { %2025 = shalt.err (!%p2022_p7)
}
  0xff   : > { %s2026_s5 = scalar_lea.vmem %s2425_s13, 2048  ;;  %s2167_s16 = smov [#allocation11]  }
 0x100   : > { %p2027_p1 = scmp.ne.s32.totalorder %s2425_s13, %s2026_s5  ;;  %s2031_s26 = sshll.u32 %s2167_s16, 4  ;;  %s2032_s26 = int_to_ptr.vmem [resolvable:$false] %s2031_s26 }
 0x101   : > { %s2033_s22 = scalar_lea.vmem %s2032_s26, 4096  ;;  %p2034_p4 = scmp.lt.s32.totalorder %s2425_s13, %s2032_s26 }
 0x102   : > { %p2029_p10 = pnand %p2027_p1, %p2819_p8  ;;  %p2035_p0 = scmp.lt.s32.totalorder %s2033_s22, %s2026_s5 }
 0x104   : > { %p2030_p12 = pneg %p2029_p10  ;;  %p2036_p9 = por %p2035_p0, %p2034_p4 }
 0x106   : > { %p2037_p3 = pnand %p2036_p9, %p2030_p12 }
 0x108   : > { %2040 = shalt.err (!%p2037_p3)
}
 0x109   : > { %1674 = dma.hbm_to_vmem [thread:$0]  (!%p2820_p13), %s2512_s21, 2048, %s2425_s13, %s2541_s15, %s2816_s10, %s2816_s10, %s2815_s9  }
 0x10a   : > { %p2822_p8 = scmp.ne.s32.totalorder %s2798_s20, 0 }
 0x10b   : > { %s446_s29 = sand.u32 (!%p2822_p8), 1, %s2147_s14   ;;  %p2823_p5 = scmp.ne.s32.totalorder (!%p2822_p8), %s2807_s24, 0 }
 0x10c   : > { %444 = sbr.rel (%p2822_p8) target bundleno = 924 (0x39c), region = 56  ;;  %s1473_s11 = sshll.u32 (!%p2822_p8), %s446_s29, 3 }
 0x10d   : > { %s447_s17 = scalar_lea.sflag (!%p2822_p8), [#allocation6], %s446_s29  ;;  %s2571_s18 = scalar_lea.vmem (!%p2822_p8), [#allocation5], %s1473_s11 }
 0x113   : > { %2110 = dma.done.wait (%p2823_p5), %s447_s17, 128  }
 0x114   : > { %2112 = vsyncadd (%p2823_p5), %s447_s17, 4294967168  ;;  %s2824_s28 = sld [smem:[#allocation32_spill]]  ;;  %s2578_s13 = scalar_lea.vmem [#allocation8], %s1473_s11 }
 0x11a   : > { %s455_s4 = sand.u32 1, %s2824_s28  }
 0x11b   : > { %s456_s23 = scalar_lea.sflag [#allocation9], %s455_s4 }
 0x11c   : > { %2114 = dma.done.wait (%p2823_p5), %s456_s23, 2176  }
 0x11d   : > { %2116 = vsyncadd (%p2823_p5), %s456_s23, 4294965120  ;;  %s1475_s20 = sshll.u32 %s446_s29, 7  ;;  %s474_s10 = scalar_lea.sflag [#allocation12], %s455_s4 }
 0x11e   : > { %s2584_s9 = scalar_lea.vmem [#allocation10], %s1475_s20  ;;  %s2586_s21 = scalar_lea.vmem [#allocation11], %s1475_s20 }
 0x11f   : > { %2118 = dma.done.wait (%p2823_p5), %s474_s10, 2048  }
 0x120   : > { %2120 = vsyncadd (%p2823_p5), %s474_s10, 4294965248  ;;  %p2825_p13 = scmp.eq.s32.totalorder %s2824_s28, 0 }
 0x122   : > { %2122 = dma.done.wait (%p2825_p13), [#allocation12], 16   ;;  %p2826_p2 = pmov %p2825_p13 }
 0x124   : > { %2124 = vsyncadd (%p2826_p2), [#allocation12], 4294967280  ;;  %p2827_p6 = pmov %p2826_p2 }
 0x125   : > { %p2828_p11 = pmov %p2826_p2 }
 0x126   : > { %2126 = dma.done.wait (%p2827_p6), [#allocation15], 528  }
 0x127   : > { %2128 = vsyncadd (%p2828_p11), [#allocation15], 4294966768  ;;  %p2829_p7 = pmov %p2826_p2 }
 0x128   : > { %p2830_p1 = pmov %p2826_p2 }
 0x129   : > { %2130 = dma.done.wait (%p2829_p7), [#allocation18], 528  }
 0x12a   : > { %2132 = vsyncadd (%p2830_p1), [#allocation18], 4294966768  ;;  %p2831_p10 = scmp.ne.s32.totalorder %s2824_s28, 0 }
 0x12b   : > { %v2168_v0 = vmov (!%p2831_p10), 0.0  }
 0x12c   : > { %552 = sbr.rel (%p2831_p10) target bundleno = 307 (0x133), region = 96  ;;  %553 = vst [vmem:[#allocation2] sm:$0xff] (!%p2831_p10), %v2168_v0  ;;  %554 = vst [vmem:[#allocation3] sm:$0xff] (!%p2831_p10), %v2168_v0 }
 0x12d   : > { %555 = vst [vmem:[#allocation4] sm:$0xff] (!%p2831_p10), %v2168_v0 }
 0x133 PF: > { %v1733_v1 = vld [vmem:[%s2584_s9 + $0x40] sm:$0xff]   ;;  %v1735_v3 = vld [vmem:[%s2584_s9 + $0x48] sm:$0xff]   ;;  %v1737_v5 = vld [vmem:[%s2584_s9 + $0x50] sm:$0xff]   ;;  %s2832_s24 = sld [smem:[#allocation32_spill]] }
 0x134   : > { %v1734_v2 = vld [vmem:[%s2584_s9] sm:$0xff]   ;;  %1538 = vmatprep.subr.bf16.mxu0 %v1733_v1  ;;  %1560 = vmatprep.subr.bf16.mxu1 %v1733_v1  ;;  %v1736_v4 = vld [vmem:[%s2584_s9 + $0x8] sm:$0xff]   ;;  %v1738_v6 = vld [vmem:[%s2584_s9 + $0x10] sm:$0xff]  }
 0x135   : > { %1539 = vmatpush3.bf16.msra.mxu0 %v1734_v2  ;;  %1561 = vmatpush3.bf16.msra.mxu1 %v1734_v2  ;;  %v1739_v7 = vld [vmem:[%s2584_s9 + $0x58] sm:$0xff]   ;;  %v1741_v9 = vld [vmem:[%s2584_s9 + $0x60] sm:$0xff]   ;;  %v1743_v11 = vld [vmem:[%s2584_s9 + $0x68] sm:$0xff]  }
 0x136   : > { %1540 = vmatprep.subr.bf16.mxu0 %v1735_v3  ;;  %1562 = vmatprep.subr.bf16.mxu1 %v1735_v3  ;;  %v1740_v8 = vld [vmem:[%s2584_s9 + $0x18] sm:$0xff]   ;;  %v1742_v10 = vld [vmem:[%s2584_s9 + $0x20] sm:$0xff]   ;;  %v1744_v14 = vld [vmem:[%s2584_s9 + $0x28] sm:$0xff]  }
 0x137   : > { %v556_v12 = vld [vmem:[%s2571_s18] sm:$0xff]  ;;  %v1745_v15 = vld [vmem:[%s2584_s9 + $0x70] sm:$0xff]   ;;  %v1747_v17 = vld [vmem:[%s2584_s9 + $0x78] sm:$0xff]  }
 0x138   : > { %v1484_v13 = vcombine.high %v556_v12, %v556_v12  ;;  %v1746_v16 = vld [vmem:[%s2584_s9 + $0x30] sm:$0xff]   ;;  %v1748_v18 = vld [vmem:[%s2584_s9 + $0x38] sm:$0xff]   ;;  %v1751_v19 = vld [vmem:[%s2586_s21 + $0x40] sm:$0xff]   ;;  %v1483_v20 = vcombine.low %v556_v12, %v556_v12 }
 0x139   : > { %1541 = vmatpush3.bf16.msra.mxu0 %v1736_v4  ;;  %1563 = vmatpush3.bf16.msra.mxu1 %v1736_v4  ;;  %v557_v21 = vld [vmem:[%s2578_s13] sm:$0xff]  ;;  %v1752_v22 = vld [vmem:[%s2586_s21] sm:$0xff]   ;;  %v1753_v25 = vld [vmem:[%s2586_s21 + $0x48] sm:$0xff]   ;;  %p1519_p12 = scmp.ne.s32.totalorder %s2832_s24, 2 }
 0x13a   : > { %1542 = vmatprep.subr.bf16.mxu0 %v1737_v5  ;;  %1564 = vmatprep.subr.bf16.mxu1 %v1737_v5  ;;  %v1501_v23 = vcombine.low %v557_v21, %v557_v21  ;;  %v1502_v24 = vcombine.high %v557_v21, %v557_v21  ;;  %v1754_v26 = vld [vmem:[%s2586_s21 + $0x8] sm:$0xff]   ;;  %v1755_v27 = vld [vmem:[%s2586_s21 + $0x50] sm:$0xff]   ;;  %v1757_v29 = vld [vmem:[%s2586_s21 + $0x58] sm:$0xff]   ;;  %vm994_vm0 = vcmask (!%p1519_p12), 1042432   ;;  %vm1060_vm1 = vcmask (!%p1519_p12), 1041409  }
 0x13b   : > { %758 = vmatprep.mubr.bf16.mxu0 %v1484_v13  ;;  %v1756_v28 = vld [vmem:[%s2586_s21 + $0x10] sm:$0xff]   ;;  %v1758_v30 = vld [vmem:[%s2586_s21 + $0x18] sm:$0xff]   ;;  %v1759_v31 = vld [vmem:[%s2586_s21 + $0x60] sm:$0xff]   ;;  %vm1062_vm2 = vcmask (!%p1519_p12), 1042434   ;;  %vm1064_vm3 = vcmask (!%p1519_p12), 1043459   ;;  %vm1066_vm4 = vcmask (!%p1519_p12), 1044484  }
 0x13c   : > { %808 = vmatprep.mubr.bf16.mxu1 %v1502_v24  ;;  %v1760_v32 = vld [vmem:[%s2586_s21 + $0x20] sm:$0xff]   ;;  %v1761_v33 = vld [vmem:[%s2586_s21 + $0x68] sm:$0xff]   ;;  %v1763_v35 = vld [vmem:[%s2586_s21 + $0x70] sm:$0xff]   ;;  %vm1068_vm5 = vcmask (!%p1519_p12), 1045509   ;;  %vm1070_vm6 = vcmask (!%p1519_p12), 1046534   ;;  %vm1072_vm7 = vcmask (!%p1519_p12), 1047559  }
 0x13d   : > { %1543 = vmatpush3.bf16.msra.mxu0 %v1738_v6  ;;  %1565 = vmatpush3.bf16.msra.mxu1 %v1738_v6  ;;  %v1762_v34 = vld [vmem:[%s2586_s21 + $0x28] sm:$0xff]   ;;  %v1764_v36 = vld [vmem:[%s2586_s21 + $0x30] sm:$0xff]   ;;  %v1767_v37 = vld [vmem:[%s2586_s21 + $0x78] sm:$0xff]  }
 0x13e   : > { %1544 = vmatprep.subr.bf16.mxu0 %v1739_v7  ;;  %1566 = vmatprep.subr.bf16.mxu1 %v1739_v7  ;;  %v1768_v38 = vld [vmem:[%s2586_s21 + $0x38] sm:$0xff]   ;;  %v622_v40 = vld [vmem:[#allocation2] sm:$0xff]  ;;  %v768_v45 = vld [vmem:[#allocation3] sm:$0xff] }
 0x13f   : > { %v818_v54 = vld [vmem:[#allocation4] sm:$0xff]  ;;  %v986_v60 = vld [vmem:[#allocation16] sm:$0x7] (!%p1519_p12)  ;;  %v987_v61 = vld [vmem:[#allocation16 + $0x4] sm:$0x7] (!%p1519_p12) }
 0x140   : > { %v988_v62 = vld [vmem:[#allocation16 + $0x8] sm:$0x7] (!%p1519_p12)  ;;  %v989_v63 = vld [vmem:[#allocation16 + $0xc] sm:$0x7] (!%p1519_p12)  ;;  %v990_v0 = vld [vmem:[#allocation16 + $0x10] sm:$0x7] (!%p1519_p12) }
 0x141   : > { %1545 = vmatpush3.bf16.msra.mxu0 %v1740_v8  ;;  %1567 = vmatpush3.bf16.msra.mxu1 %v1740_v8  ;;  %v991_v1 = vld [vmem:[#allocation16 + $0x14] sm:$0x7] (!%p1519_p12)  ;;  %v992_v2 = vld [vmem:[#allocation16 + $0x18] sm:$0x7] (!%p1519_p12)  ;;  %v995_v3 = vsel (!%p1519_p12), %vm994_vm0, %v986_v60, -inf  ;;  %v1002_v4 = vsel (!%p1519_p12), %vm994_vm0, %v987_v61, -inf }
 0x142   : > { %1546 = vmatprep.subr.bf16.mxu0 %v1741_v9  ;;  %1568 = vmatprep.subr.bf16.mxu1 %v1741_v9  ;;  %v993_v5 = vld [vmem:[#allocation16 + $0x1c] sm:$0x7] (!%p1519_p12)  ;;  %v996_v6 = vrot.slane (!%p1519_p12), %v995_v3, 4  ;;  %v1003_v7 = vrot.slane (!%p1519_p12), %v1002_v4, 4  ;;  %v1009_v8 = vsel (!%p1519_p12), %vm994_vm0, %v988_v62, -inf }
 0x143   : > { %v1010_v9 = vrot.slane (!%p1519_p12), %v1009_v8, 4 }
 0x144   : > { %v997_v12 = vmax.f32 (!%p1519_p12), %v995_v3, %v996_v6  ;;  %v1004_v13 = vmax.f32 (!%p1519_p12), %v1002_v4, %v1003_v7  ;;  %v1130_v4 = vld [vmem:[#allocation17 + $0x14] sm:$0x7] (!%p1519_p12) }
 0x145   : > { %1547 = vmatpush3.bf16.msra.mxu0 %v1742_v10  ;;  %1569 = vmatpush3.bf16.msra.mxu1 %v1742_v10  ;;  %v1016_v10 = vsel (!%p1519_p12), %vm994_vm0, %v989_v63, -inf }
 0x146   : > { %1548 = vmatprep.subr.bf16.mxu0 %v1743_v11  ;;  %1570 = vmatprep.subr.bf16.mxu1 %v1743_v11  ;;  %v1023_v11 = vsel (!%p1519_p12), %vm994_vm0, %v990_v0, -inf  ;;  %v1005_v21 = vrot.slane (!%p1519_p12), %v1004_v13, 2 }
 0x149   : > { %1549 = vmatpush3.bf16.msra.mxu0 %v1744_v14  ;;  %1571 = vmatpush3.bf16.msra.mxu1 %v1744_v14  ;;  %v1017_v14 = vrot.slane (!%p1519_p12), %v1016_v10, 4 }
 0x14a   : > { %1550 = vmatprep.subr.bf16.mxu0 %v1745_v15  ;;  %1572 = vmatprep.subr.bf16.mxu1 %v1745_v15  ;;  %v1024_v15 = vrot.slane (!%p1519_p12), %v1023_v11, 4 }
 0x14d   : > { %1551 = vmatpush3.bf16.msra.mxu0 %v1746_v16  ;;  %1573 = vmatpush3.bf16.msra.mxu1 %v1746_v16  ;;  %v1011_v16 = vmax.f32 (!%p1519_p12), %v1009_v8, %v1010_v9 }
 0x14e   : > { %1552 = vmatprep.subr.bf16.mxu0 %v1747_v17  ;;  %1574 = vmatprep.subr.bf16.mxu1 %v1747_v17  ;;  %v1030_v17 = vsel (!%p1519_p12), %vm994_vm0, %v991_v1, -inf }
 0x151   : > { %1553 = vmatpush3.bf16.msra.mxu0 %v1748_v18  ;;  %1575 = vmatpush3.bf16.msra.mxu1 %v1748_v18  ;;  %v1037_v18 = vsel (!%p1519_p12), %vm994_vm0, %v992_v2, -inf }
 0x152   : > { %1582 = vmatprep.subr.bf16.mxu0 %v1751_v19  ;;  %v1044_v19 = vsel (!%p1519_p12), %vm994_vm0, %v993_v5, -inf }
 0x154   : > { %759 = vmatmul.mubr.bf16.vlgmr.msra.gmra.mrb[0].mxu0 %v1483_v20  ;;  %809 = vmatmul.mubr.bf16.vlgmr.msra.gmra.mrb[0].mxu1 %v1501_v23  ;;  %v998_v20 = vrot.slane (!%p1519_p12), %v997_v12, 2 }
 0x155   : > { %1583 = vmatpush3.bf16.msra.mxu0 %v1752_v22  ;;  %947 = vmatprep.mubr.bf16.mxu0 %v1502_v24  ;;  %v1018_v22 = vmax.f32 (!%p1519_p12), %v1016_v10, %v1017_v14  ;;  %v1012_v24 = vrot.slane (!%p1519_p12), %v1011_v16, 2 }
 0x156   : > { %1584 = vmatprep.subr.bf16.mxu0 %v1753_v25  ;;  %v1031_v25 = vrot.slane (!%p1519_p12), %v1030_v17, 4 }
 0x159   : > { %1585 = vmatpush3.bf16.msra.mxu0 %v1754_v26  ;;  %v1038_v26 = vrot.slane (!%p1519_p12), %v1037_v18, 4 }
 0x15a   : > { %1586 = vmatprep.subr.bf16.mxu0 %v1755_v27  ;;  %v999_v27 = vmax.f32 (!%p1519_p12), %v997_v12, %v998_v20  ;;  %v1131_v12 = vld [vmem:[#allocation17 + $0x18] sm:$0x7] (!%p1519_p12) }
 0x15d   : > { %1587 = vmatpush3.bf16.msra.mxu0 %v1756_v28  ;;  %v1006_v28 = vmax.f32 (!%p1519_p12), %v1004_v13, %v1005_v21 }
 0x15e   : > { %1588 = vmatprep.subr.bf16.mxu0 %v1757_v29  ;;  %v1019_v29 = vrot.slane (!%p1519_p12), %v1018_v22, 2 }
 0x161   : > { %1589 = vmatpush3.bf16.msra.mxu0 %v1758_v30  ;;  %v1032_v30 = vmax.f32 (!%p1519_p12), %v1030_v17, %v1031_v25 }
 0x162   : > { %1590 = vmatprep.subr.bf16.mxu0 %v1759_v31  ;;  %v1045_v31 = vrot.slane (!%p1519_p12), %v1044_v19, 4 }
 0x165   : > { %1591 = vmatpush3.bf16.msra.mxu0 %v1760_v32  ;;  %v1013_v32 = vmax.f32 (!%p1519_p12), %v1011_v16, %v1012_v24 }
 0x166   : > { %1592 = vmatprep.subr.bf16.mxu0 %v1761_v33 }
 0x169   : > { %1593 = vmatpush3.bf16.msra.mxu0 %v1762_v34  ;;  %v1039_v34 = vmax.f32 (!%p1519_p12), %v1037_v18, %v1038_v26  ;;  %v1168_v18 = vsel (!%p1519_p12), %vm994_vm0, %v1130_v4, -inf }
 0x16a   : > { %1594 = vmatprep.subr.bf16.mxu0 %v1763_v35  ;;  %v1169_v26 = vrot.slane (!%p1519_p12), %v1168_v18, 4 }
 0x16d   : > { %1595 = vmatpush3.bf16.msra.mxu0 %v1764_v36  ;;  %v2649_v36 = vld [vmem:[#allocation13] ss:$0 sm:$0xff] (!%p1519_p12) }
 0x16e   : > { %1596 = vmatprep.subr.bf16.mxu0 %v1767_v37  ;;  %v1000_v37 = vrot.slane (!%p1519_p12), %v999_v27, 1 }
 0x171   : > { %1597 = vmatpush3.bf16.msra.mxu0 %v1768_v38  ;;  %v1007_v38 = vrot.slane (!%p1519_p12), %v1006_v28, 1 }
 0x174   : > { %948 = vmatmul.mubr.bf16.vlgmr.msra.gmra.mrb[4].mxu0 %v1501_v23  ;;  %v1025_v23 = vmax.f32 (!%p1519_p12), %v1023_v11, %v1024_v15 }
 0x176   : > { %v1026_v33 = vrot.slane (!%p1519_p12), %v1025_v23, 2 }
 0x227   : > { %v1554_v39 = vpop.f32.mrb[0].mxu0  ;;  %v1576_v42 = vpop.f32.mrb[0].mxu1 }
 0x228   : > { %v1555_v41 = vpop.f32.mrb[1].mxu0  ;;  %v1577_v46 = vpop.f32.mrb[1].mxu1 }
 0x229   : > { %v1556_v43 = vadd.f32 %v1555_v41, %v1554_v39  ;;  %v1557_v44 = vpop.f32.mrb[2].mxu0  ;;  %v1578_v48 = vadd.f32 %v1577_v46, %v1576_v42  ;;  %v1579_v49 = vpop.f32.mrb[2].mxu1  ;;  %v1020_v39 = vmax.f32 (!%p1519_p12), %v1018_v22, %v1019_v29  ;;  %v1046_v41 = vmax.f32 (!%p1519_p12), %v1044_v19, %v1045_v31 }
 0x22a   : > { %v1558_v47 = vpop.f32.mrb[3].mxu0  ;;  %v1580_v51 = vpop.f32.mrb[3].mxu1  ;;  %v1027_v44 = vmax.f32 (!%p1519_p12), %v1025_v23, %v1026_v33  ;;  %v1001_v46 = vmax.f32 (!%p1519_p12), %v999_v27, %v1000_v37  ;;  %v1125_v49 = vld [vmem:[#allocation17] sm:$0x7] (!%p1519_p12)  ;;  %v1132_v23 = vld [vmem:[#allocation17 + $0x1c] sm:$0x7] (!%p1519_p12)  ;;  %v1170_v37 = vmax.f32 (!%p1519_p12), %v1168_v18, %v1169_v26 }
 0x22b   : > { %v766_v50 = vadd.f32 %v1556_v43, %v622_v40  ;;  %v816_v52 = vadd.f32 %v1578_v48, %v768_v45  ;;  %v1033_v40 = vrot.slane (!%p1519_p12), %v1032_v30, 2  ;;  %v1014_v43 = vrot.slane (!%p1519_p12), %v1013_v32, 1 }
 0x22c   : > { %v1040_v45 = vrot.slane (!%p1519_p12), %v1039_v34, 2  ;;  %v1008_v47 = vmax.f32 (!%p1519_p12), %v1006_v28, %v1007_v38  ;;  %v1021_v48 = vrot.slane (!%p1519_p12), %v1020_v39, 1  ;;  %v1133_v62 = vsel (!%p1519_p12), %vm994_vm0, %v1125_v49, -inf  ;;  %v1521_v49 = vld [vmem:[#allocation14] ss:$0 sm:$0xff] (!%p1519_p12) }
 0x22d   : > { %767 = vst [vmem:[#allocation2] sm:$0xff] %v766_v50  ;;  %817 = vst [vmem:[#allocation3] sm:$0xff] %v816_v52  ;;  %v1126_v50 = vld [vmem:[#allocation17 + $0x4] sm:$0x7] (!%p1519_p12)  ;;  %v1034_v51 = vmax.f32 (!%p1519_p12), %v1032_v30, %v1033_v40  ;;  %v1047_v52 = vrot.slane (!%p1519_p12), %v1046_v41, 2  ;;  %v1134_v1 = vrot.slane (!%p1519_p12), %v1133_v62, 4 }
 0x22e   : > { %v1022_v60 = vmax.f32 (!%p1519_p12), %v1020_v39, %v1021_v48  ;;  %v1061_v61 = vsel (!%p1519_p12), %vm1060_vm1, %v1008_v47, %v1001_v46  ;;  %v1140_v63 = vsel (!%p1519_p12), %vm994_vm0, %v1126_v50, -inf  ;;  %v1175_v27 = vsel (!%p1519_p12), %vm994_vm0, %v1131_v12, -inf }
 0x22f   : > { %v1141_v2 = vrot.slane (!%p1519_p12), %v1140_v63, 4  ;;  %v1035_v3 = vrot.slane (!%p1519_p12), %v1034_v51, 1  ;;  %v1135_v9 = vmax.f32 (!%p1519_p12), %v1133_v62, %v1134_v1  ;;  %v1048_v20 = vmax.f32 (!%p1519_p12), %v1046_v41, %v1047_v52 }
 0x230   : > { %v1176_v38 = vrot.slane (!%p1519_p12), %v1175_v27, 4  ;;  %v1182_v39 = vsel (!%p1519_p12), %vm994_vm0, %v1132_v23, -inf }
 0x231   : > { %v1142_v10 = vmax.f32 (!%p1519_p12), %v1140_v63, %v1141_v2  ;;  %v1136_v16 = vrot.slane (!%p1519_p12), %v1135_v9, 2  ;;  %v1049_v46 = vrot.slane (!%p1519_p12), %v1048_v20, 1  ;;  %v1183_v52 = vrot.slane (!%p1519_p12), %v1182_v39, 4 }
 0x233   : > { %v1143_v17 = vrot.slane (!%p1519_p12), %v1142_v10, 2  ;;  %v1137_v24 = vmax.f32 (!%p1519_p12), %v1135_v9, %v1136_v16  ;;  %v1050_v62 = vmax.f32 (!%p1519_p12), %v1048_v20, %v1049_v46  ;;  %v1184_v2 = vmax.f32 (!%p1519_p12), %v1182_v39, %v1183_v52 }
 0x234   : > { %v961_v35 = vld [vmem:[#allocation2] sm:$0xff] (!%p1519_p12)  ;;  %v970_v29 = vld [vmem:[#allocation3] sm:$0xff] (!%p1519_p12) }
 0x235   : > { %v2652_v42 = vadd.f32 (!%p1519_p12), %v2649_v36, %v961_v35  ;;  %v1144_v25 = vmax.f32 (!%p1519_p12), %v1142_v10, %v1143_v17  ;;  %v2668_v41 = vadd.f32 (!%p1519_p12), %v2649_v36, %v970_v29 }
 0x247   : > { %v1598_v53 = vpop.f32.mrb[4].mxu0  ;;  %960 = sbr.rel (%p1519_p12) target bundleno = 861 (0x35d), region = 100 }
 0x248   : > { %v1599_v55 = vpop.f32.mrb[5].mxu0 }
 0x249   : > { %v1600_v56 = vadd.f32 %v1599_v55, %v1598_v53  ;;  %v1601_v57 = vpop.f32.mrb[6].mxu0  ;;  %v1127_v53 = vld [vmem:[#allocation17 + $0x8] sm:$0x7] (!%p1519_p12)  ;;  %v1015_v55 = vmax.f32 (!%p1519_p12), %v1013_v32, %v1014_v43  ;;  %v1036_v32 = vmax.f32 (!%p1519_p12), %v1034_v51, %v1035_v3  ;;  %v1138_v43 = vrot.slane (!%p1519_p12), %v1137_v24, 1 }
 0x24a   : > { %v1602_v58 = vpop.f32.mrb[7].mxu0  ;;  %v1041_v57 = vmax.f32 (!%p1519_p12), %v1039_v34, %v1040_v45  ;;  %v1147_v5 = vsel (!%p1519_p12), %vm994_vm0, %v1127_v53, -inf  ;;  %v981_v45 = vlaneseq (!%p1519_p12) }
 0x24b   : > { %v955_v59 = vadd.f32 %v1600_v56, %v818_v54  ;;  %v1128_v54 = vld [vmem:[#allocation17 + $0xc] sm:$0x7] (!%p1519_p12)  ;;  %v1028_v56 = vrot.slane (!%p1519_p12), %v1027_v44, 1  ;;  %v1077_v58 = vand.u32 (!%p1519_p12), 2147483647, %v2652_v42  ;;  %v1063_v11 = vsel (!%p1519_p12), %vm1062_vm2, %v1015_v55, %v1061_v61 }
 0x24c   : > { %v1154_v6 = vsel (!%p1519_p12), %vm994_vm0, %v1128_v54, -inf  ;;  %v1148_v13 = vrot.slane (!%p1519_p12), %v1147_v5, 4  ;;  %v1065_v28 = vsel (!%p1519_p12), %vm1064_vm3, %v1022_v60, %v1063_v11  ;;  %v1042_v33 = vrot.slane (!%p1519_p12), %v1041_v57, 1 }
 0x24d   : > { %956 = vst [vmem:[#allocation4] sm:$0xff] %v955_v59  ;;  %v1129_v59 = vld [vmem:[#allocation17 + $0x10] sm:$0x7] (!%p1519_p12)  ;;  %v1078_v0 = vsub.f32 (!%p1519_p12), 0.0, %v1077_v58  ;;  %v1155_v14 = vrot.slane (!%p1519_p12), %v1154_v6, 4  ;;  %v1029_v19 = vmax.f32 (!%p1519_p12), %v1027_v44, %v1028_v56  ;;  %v1145_v44 = vrot.slane (!%p1519_p12), %v1144_v25, 1 }
 0x24e   : > { %v1161_v7 = vsel %vm994_vm0, %v1129_v59, -inf  ;;  %v1149_v21 = vmax.f32 %v1147_v5, %v1148_v13  ;;  %v1043_v50 = vmax.f32 %v1041_v57, %v1042_v33  ;;  %v1171_v55 = vrot.slane %v1170_v37, 2 }
 0x24f   : > { %v1079_v8 = vmul.f32 1.442695, %v1078_v0  ;;  %v1162_v15 = vrot.slane %v1161_v7, 4  ;;  %v1156_v22 = vmax.f32 %v1154_v6, %v1155_v14  ;;  %v1067_v40 = vsel %vm1066_vm4, %v1029_v19, %v1065_v28 }
 0x250   : > { %v1150_v30 = vrot.slane %v1149_v21, 2  ;;  %v1069_v53 = vsel %vm1068_vm5, %v1036_v32, %v1067_v40  ;;  %v1177_v56 = vmax.f32 %v1175_v27, %v1176_v38  ;;  %v1139_v59 = vmax.f32 %v1137_v24, %v1138_v43 }
 0x251   : > { %1769 = vpow2.f32 %v1079_v8  ;;  %v1163_v31 = vmax.f32 %v1161_v7, %v1162_v15  ;;  %v1157_v34 = vrot.slane %v1156_v22, 2  ;;  %v1146_v36 = vmax.f32 %v1144_v25, %v1145_v44 }
 0x252   : > { %v1151_v35 = vmax.f32 %v1149_v21, %v1150_v30  ;;  %v1208_v60 = vand.u32 2147483647, %v2668_v41  ;;  %v1071_v57 = vsel %vm1070_vm6, %v1043_v50, %v1069_v53  ;;  %v1172_v5 = vmax.f32 %v1170_v37, %v1171_v55  ;;  %v1523_v50 = vld [vmem:[#allocation19] ss:$0 sm:$0xff] }
 0x253   : > { %v1164_v47 = vrot.slane %v1163_v31, 2  ;;  %v1158_v51 = vmax.f32 %v1156_v22, %v1157_v34  ;;  %v1178_v6 = vrot.slane %v1177_v56, 2  ;;  %v1198_v8 = vsel %vm1060_vm1, %v1146_v36, %v1139_v59 }
 0x254   : > { %v972_v48 = vld [vmem:[#allocation4] sm:$0xff]  ;;  %v1152_v54 = vrot.slane %v1151_v35, 1  ;;  %v1209_v3 = vsub.f32 0.0, %v1208_v60  ;;  %v1073_v11 = vsel %vm1072_vm7, %v1050_v62, %v1071_v57  ;;  %v1185_v14 = vrot.slane %v1184_v2, 2 }
 0x255   : > { %v980_v61 = vadd.f32 %v1521_v49, %v972_v48  ;;  %v1165_v0 = vmax.f32 %v1163_v31, %v1164_v47  ;;  %v1159_v1 = vrot.slane %v1158_v51, 1  ;;  %v1179_v16 = vmax.f32 %v1177_v56, %v1178_v6 }
 0x256   : > { %v1153_v4 = vmax.f32 %v1151_v35, %v1152_v54  ;;  %v1210_v9 = vmul.f32 1.442695, %v1209_v3  ;;  %v2676_v18 = vand.u32 127, %v981_v45  ;;  %v1173_v20 = vrot.slane %v1172_v5, 1 }
 0x257   : > { %v1109_v10 = vrot.slane %v980_v61, 4  ;;  %v1166_v12 = vrot.slane %v1165_v0, 1  ;;  %v1160_v13 = vmax.f32 %v1158_v51, %v1159_v1  ;;  %v1051_v22 = vmax.f32 %v2652_v42, 0.0 }
 0x258   : > { %v1199_v17 = vsel %vm1062_vm2, %v1153_v4, %v1198_v8  ;;  %v1075_v23 = vmul.f32 %v1073_v11, %v2652_v42  ;;  %v1186_v26 = vmax.f32 %v1184_v2, %v1185_v14  ;;  %v1180_v29 = vrot.slane %v1179_v16, 1 }
 0x259   : > { %v1110_v15 = vadd.f32 %v1109_v10, %v980_v61  ;;  %v1167_v25 = vmax.f32 %v1165_v0, %v1166_v12  ;;  %v1200_v27 = vsel %vm1064_vm3, %v1160_v13, %v1199_v17  ;;  %v1174_v31 = vmax.f32 %v1172_v5, %v1173_v20 }
 0x25a   : > { %vm983_vm8 = vcmp.lt.s32.totalorder %v2676_v18, 80  ;;  %v1076_v34 = vsub.f32 %v1051_v22, %v1075_v23  ;;  %v1187_v38 = vrot.slane %v1186_v26, 1  ;;  %v1181_v39 = vmax.f32 %v1179_v16, %v1180_v29 }
 0x25b   : > { %v1770_v58 = vpop.eup %1769  ;;  %v1111_v21 = vrot.slane %v1110_v15, 2  ;;  %v1201_v35 = vsel %vm1066_vm4, %v1167_v25, %v1200_v27  ;;  %v2169_v43 = vmov 0.0   ;;  %v1189_v36 = vmax.f32 %v2668_v41, 0.0 }
 0x25c   : > { %v1081_v63 = vadd.f32 1.0, %v1770_v58  ;;  %v1084_v7 = vmul.f32 -0.5, %v1770_v58  ;;  %v1087_v24 = vand.u32 2147483647, %v1770_v58  ;;  %v1522_v44 = vsel %vm983_vm8, 1.0, %v2169_v43 }
 0x25d   : > { %v1112_v28 = vadd.f32 %v1111_v21, %v1110_v15  ;;  %v1202_v46 = vsel %vm1068_vm5, %v1174_v31, %v1201_v35  ;;  %v1188_v51 = vmax.f32 %v1186_v26, %v1187_v38  ;;  %vm1242_vm11 = vcmp.eq.s32.totalorder %v2676_v18, 0 }
 0x25e   : > { %1771 = vlog2.f32 %v1081_v63  ;;  %v1085_v19 = vadd.f32 1.0, %v1084_v7  ;;  %vm1088_vm9 = vcmp.lt.f32.partialorder %v1087_v24, 0.0004427343  ;;  %v1203_v54 = vsel %vm1070_vm6, %v1181_v39, %v1202_v46 }
 0x25f   : > { %1773 = vpow2.f32 %v1210_v9  ;;  %v1113_v32 = vrot.slane %v1112_v28, 1  ;;  %vm1247_vm12 = vcmp.eq.s32.totalorder %v2676_v18, 1  ;;  %vm1253_vm13 = vcmp.eq.s32.totalorder %v2676_v18, 2 }
 0x260   : > { %v1086_v30 = vmul.f32 %v1770_v58, %v1085_v19  ;;  %v1204_v58 = vsel %vm1072_vm7, %v1188_v51, %v1203_v54 }
 0x261   : > { %v1114_v42 = vadd.f32 %v1113_v32, %v1112_v28  ;;  %v1206_v60 = vmul.f32 %v1204_v58, %v2668_v41  ;;  %v1526_v32 = vsel %vm1247_vm12, 1.0, %v2169_v43 }
 0x263   : > { %v1524_v47 = vmul.f32 -0.125, %v1114_v42  ;;  %v1207_v0 = vsub.f32 %v1189_v36, %v1206_v60 }
 0x265   : > { %v1118_v52 = vmul.f32 1.442695, %v1524_v47 }
 0x268   : > { %v1772_v33 = vpop.eup %1771 }
 0x269   : > { %v1083_v37 = vmul.f32 0.6931472, %v1772_v33  ;;  %v1774_v40 = vpop.eup %1773 }
 0x26a   : > { %v1212_v49 = vadd.f32 1.0, %v1774_v40  ;;  %v1215_v55 = vmul.f32 -0.5, %v1774_v40  ;;  %v1218_v61 = vand.u32 2147483647, %v1774_v40 }
 0x26b   : > { %v1089_v45 = vsel %vm1088_vm9, %v1086_v30, %v1083_v37  ;;  %v1525_v30 = vsel %vm1242_vm11, 1.0, %v2169_v43 }
 0x26c   : > { %v1090_v48 = vadd.f32 %v1089_v45, %v1076_v34  ;;  %1775 = vlog2.f32 %v1212_v49  ;;  %v1216_v59 = vadd.f32 1.0, %v1215_v55  ;;  %vm1219_vm10 = vcmp.lt.f32.partialorder %v1218_v61, 0.0004427343 }
 0x26d   : > { %1777 = vpow2.f32 %v1118_v52  ;;  %v1527_v34 = vsel %vm1253_vm13, 1.0, %v2169_v43 }
 0x26e   : > { %v1091_v53 = vmul.f32 %v1522_v44, %v1090_v48  ;;  %v1217_v62 = vmul.f32 %v1774_v40, %v1216_v59 }
 0x270   : > { %v1099_v56 = vmul.f32 %v1523_v50, %v1091_v53 }
 0x272   : > { %1100 = vadd.xlane.f32.xlu0 %v1099_v56 }
 0x276   : > { %v1776_v63 = vpop.eup %1775 }
 0x277   : > { %v1778_v57 = vpop.eup %1777  ;;  %v1214_v1 = vmul.f32 0.6931472, %v1776_v63 }
 0x278   : > { %v1120_v2 = vadd.f32 1.0, %v1778_v57 }
 0x279   : > { %v1220_v3 = vsel %vm1219_vm10, %v1217_v62, %v1214_v1 }
 0x27a   : > { %v1221_v4 = vadd.f32 %v1220_v3, %v1207_v0  ;;  %1779 = vrcp.f32 %v1120_v2 }
 0x27c   : > { %v1222_v5 = vmul.f32 %v1522_v44, %v1221_v4 }
 0x27e   : > { %1233 = vadd.xlane.f32.xlu1 %v1222_v5 }
 0x284   : > { %v1780_v6 = vpop.eup %1779 }
 0x285   : > { %v1123_v7 = vmul.f32 %v1780_v6, %v1522_v44 }
 0x287   : > { %1124 = vst [vmem:[#allocation21] sm:$0x1] %v1123_v7  ;;  %v1223_v8 = vmul.f32 %v1222_v5, %v1123_v7 }
 0x289   : > { %1224 = vadd.xlane.f32.xlu0 %v1223_v8 }
 0x2ff   : > { %v1101_v9 = vpop.xlane.xlu0 %1100 }
 0x300   : > { %v1102_v41 = vrot.slane %v1101_v9, 4 }
 0x302   : > { %v1103_v10 = vadd.f32 %v1102_v41, %v1101_v9 }
 0x304   : > { %v1104_v11 = vrot.slane %v1103_v10, 2 }
 0x306   : > { %v1105_v12 = vadd.f32 %v1104_v11, %v1103_v10 }
 0x308   : > { %v1106_v13 = vrot.slane %v1105_v12, 1 }
 0x30a   : > { %v1107_v14 = vadd.f32 %v1106_v13, %v1105_v12 }
 0x30b   : > { %v1234_v15 = vpop.xlane.xlu1 %1233 }
 0x30c   : > { %1604 = vpush %v1107_v14  ;;  %v1235_v16 = vrot.slane %v1234_v15, 4 }
 0x30e   : > { %v1236_v17 = vadd.f32 %v1235_v16, %v1234_v15 }
 0x310   : > { %v1237_v19 = vrot.slane %v1236_v17, 2 }
 0x312   : > { %v1238_v23 = vadd.f32 %v1237_v19, %v1236_v17 }
 0x314   : > { %v1239_v26 = vrot.slane %v1238_v23, 1 }
 0x316   : > { %v1225_v20 = vpop.xlane.xlu0 %1224  ;;  %v1240_v29 = vadd.f32 %v1239_v26, %v1238_v23 }
 0x317   : > { %v1226_v21 = vrot.slane %v1225_v20, 4 }
 0x319   : > { %v1227_v22 = vadd.f32 %v1226_v21, %v1225_v20 }
 0x31b   : > { %v1228_v24 = vrot.slane %v1227_v22, 2 }
 0x31d   : > { %v1229_v25 = vadd.f32 %v1228_v24, %v1227_v22 }
 0x31f   : > { %v1230_v27 = vrot.slane %v1229_v25, 1 }
 0x321   : > { %v1231_v28 = vadd.f32 %v1230_v27, %v1229_v25 }
 0x323   : > { %1606 = vpush %v1231_v28 }
 0x324   : > { %1608 = vpush %v1240_v29 }
 0x33d   : > { %s1605_s1 = spop %1604 }
 0x33e   : > { %v1245_v31 = vstv %s1605_s1 }
 0x33f   : > { %v1246_v35 = vmul.f32 %v1525_v30, %v1245_v31 }
 0x354   : > { %s1607_s15 = spop %1606 }
 0x355   : > { %v1250_v33 = vstv %s1607_s15  ;;  %s1609_s30 = spop %1608 }
 0x356   : > { %v1251_v37 = vmul.f32 %v1526_v32, %v1250_v33  ;;  %v1256_v38 = vstv %s1609_s30 }
 0x357   : > { %v1257_v39 = vmul.f32 %v1527_v34, %v1256_v38 }
 0x358   : > { %v1252_v42 = vadd.f32 %v1251_v37, %v1246_v35 }
 0x35a   : > { %v1258_v40 = vadd.f32 %v1257_v39, %v1252_v42 }
 0x35c   : > { %1259 = vst [vmem:[#allocation20] sm:$0x1] %v1258_v40 }
 0x35d PF: > { %s2833_s19 = sld [smem:[#allocation32_spill]]  ;;  %s2170_s12 = smov [#allocation20]  }
 0x35e   : > { %s1267_s27 = sshll.u32 %s2170_s12, 4  ;;  %s2171_s7 = smov [#allocation21]   ;;  %s1268_s27 = int_to_ptr.vmem [resolvable:$true] %s1267_s27 }
 0x35f   : > { %s1278_s25 = sshll.u32 %s2171_s7, 4  ;;  %s2041_s5 = scalar_lea.vmem %s1268_s27, 16  ;;  %s1279_s25 = int_to_ptr.vmem [resolvable:$true] %s1278_s25 }
 0x360   : > { %p2042_p0 = scmp.ne.s32.totalorder %s1268_s27, %s2041_s5  ;;  %s2047_s16 = scalar_lea.vmem %s1268_s27, 32 }
 0x361   : > { %p2048_p8 = scmp.lt.s32.totalorder %s1268_s27, %s1268_s27  ;;  %p2049_p5 = scmp.lt.s32.totalorder %s2047_s16, %s2041_s5 }
 0x363   : > { %p1686_p4 = scmp.eq.s32.totalorder %s2833_s19, 2  ;;  %p2050_p13 = por %p2049_p5, %p2048_p8 }
 0x365   : > { %p2043_p9 = pnand %p2042_p0, %p1686_p4 }
 0x367   : > { %p2044_p3 = pneg %p2043_p9 }
 0x369   : > { %p2051_p2 = pnand %p2050_p13, %p2044_p3 }
 0x36b   : > { %2054 = shalt.err (!%p2051_p2)
}
 0x36c   : > { %s2834_s29 = sld [smem:[#allocation39_spill]] }
 0x372   : > { %s2055_s11 = scalar_lea.hbm %s2834_s29, 16 }
 0x373   : > { %p2056_p6 = scmp.ne.s32.totalorder %s2834_s29, %s2055_s11  ;;  %p2061_p1 = scmp.lt.u32.totalorder %s2055_s11, %s2834_s29 }
 0x375   : > { %p2057_p11 = pnand %p2056_p6, %p1686_p4 }
 0x377   : > { %p2058_p7 = pneg %p2057_p11 }
 0x379   : > { %p2063_p10 = pnand %p2061_p1, %p2058_p7 }
 0x37b   : > { %2066 = shalt.err (!%p2063_p10)
}
 0x37c   : > { %1639 = dma.vmem_to_hbm [thread:$0]  (%p1686_p4), %s1268_s27, 16, %s2834_s29, [#allocation7]  }
 0x37d   : > { %s2067_s20 = scalar_lea.vmem %s1279_s25, 16  ;;  %s2073_s9 = scalar_lea.vmem %s1279_s25, 32 }
 0x37e   : > { %p2068_p12 = scmp.ne.s32.totalorder %s1279_s25, %s2067_s20  ;;  %p2074_p3 = scmp.lt.s32.totalorder %s1279_s25, %s1279_s25 }
 0x37f   : > { %p2075_p8 = scmp.lt.s32.totalorder %s2073_s9, %s2067_s20 }
 0x380   : > { %p2069_p0 = pnand %p2068_p12, %p1686_p4 }
 0x381   : > { %p2076_p5 = por %p2075_p8, %p2074_p3 }
 0x382   : > { %p2070_p9 = pneg %p2069_p0 }
 0x384   : > { %p2077_p13 = pnand %p2076_p5, %p2070_p9 }
 0x386   : > { %2080 = shalt.err (!%p2077_p13)
}
 0x387   : > { %s2835_s24 = sld [smem:[#allocation40_spill]] }
 0x38d   : > { %s2081_s1 = scalar_lea.hbm %s2835_s24, 16 }
 0x38e   : > { %p2082_p2 = scmp.ne.s32.totalorder %s2835_s24, %s2081_s1  ;;  %p2087_p7 = scmp.lt.u32.totalorder %s2081_s1, %s2835_s24 }
 0x390   : > { %p2083_p6 = pnand %p2082_p2, %p1686_p4 }
 0x392   : > { %p2084_p11 = pneg %p2083_p6 }
 0x394   : > { %p2089_p1 = pnand %p2087_p7, %p2084_p11 }
 0x396   : > { %2092 = shalt.err (!%p2089_p1)
}
 0x397   : > { %1641 = dma.vmem_to_hbm [thread:$0]  (%p1686_p4), %s1279_s25, 16, %s2835_s24, [#allocation22]  }
 0x398   : > { %2134 = dma.done.wait (%p1686_p4), [#allocation7], 16  }
 0x399   : > { %2136 = vsyncadd (%p1686_p4), [#allocation7], 4294967280 }
 0x39a   : > { %2138 = dma.done.wait (%p1686_p4), [#allocation22], 16  }
 0x39b   : > { %2140 = vsyncadd (%p1686_p4), [#allocation22], 4294967280 }
 0x39c PF: > { %s2836_s16 = sld [smem:[#allocation33_spill]]  ;;  %s2837_s26 = sld [smem:[#allocation31_spill]] }
 0x39d   : > { %s2838_s15 = sld [smem:[#allocation34_spill]]  ;;  %s2839_s13 = smov %s2147_s14 }
 0x3a2   : > { %p31_p10 = scmp.ge.s32.totalorder %s2836_s16, 5   ;;  %s2840_s14 = smov %s2837_s26 }
 0x3a4   :  { %33 = sbr.rel (!%p31_p10) target bundleno = 18 (0x12), region = 166 }
 0x3ab   :  { %1295 = vsyncpa [#allocation6], 1 }
 0x3ac   :  { %1297 = vsyncpa [#allocation6 + $0x1], 1 }
 0x3ad   :  { %1298 = vsyncpa [#allocation9], 1 }
 0x3ae   :  { %1300 = vsyncpa [#allocation9 + $0x1], 1 }
 0x3af   :  { %1301 = vsyncpa [#allocation12], 1 }
 0x3b0   :  { %1303 = vsyncpa [#allocation12 + $0x1], 1 }
 0x3b1   :  { %1304 = vsyncpa [#allocation15], 1 }
 0x3b2   :  { %1305 = vsyncpa [#allocation18], 1 }
 0x3b3   :  { %1306 = vsyncpa [#allocation7], 1 }
 0x3b4   :  { %1308 = vsyncpa [#allocation7 + $0x1], 1 }
 0x3b5   :  { %1309 = vsyncpa [#allocation22], 1 }

</bundles_post_ra>
